<compile_context>
chip_gen: v7x
topology: tpu7x:2x2x1
jax: 0.10.0
libtpu: 0.0.40
codegen_flags: <defaults>
</compile_context>

<pallas_src>
import jax
import jax.numpy as jnp
from jax import lax
from jax.experimental import pallas as pl
from jax.experimental.pallas import tpu as pltpu


# -----------------------------------------------------------------------------
# Pallas kernel
# -----------------------------------------------------------------------------
def make_lstm_kernel(B, T, E, H, O, L):
    """Builds a kernel with signature:
       kernel(x2d, [w_ih, w_hh, b] * L, fc_w, fc_b, out, seq_scratch)

       x2d:  [T*B, E]   time-major flattened embedded input
       w_ih: [in, 4H]   (in = E for layer 0, H otherwise)
       w_hh: [H, 4H]
       b:    [1, 4H]    (b_ih + b_hh fused)
       fc_w: [H, O], fc_b: [1, O]
       out:  [B, O]
       seq_scratch: [T*B, H] VMEM (inter-layer hidden sequence)
    """

    def kernel(*refs):
        x_ref = refs[0]                           # [T*B, E]
        layer_refs = refs[1:1 + 3 * L]            # per layer: [in,4H], [H,4H], [1,4H]
        fc_w_ref = refs[1 + 3 * L]                # [H, O]
        fc_b_ref = refs[2 + 3 * L]                # [1, O]
        out_ref = refs[3 + 3 * L]                 # [B, O]
        seq_ref = refs[4 + 3 * L]                 # scratch [T*B, H]

        h_last = None
        for l in range(L):                        # L is static -> unrolled
            w_ih = layer_refs[3 * l][...]         # [in, 4H]
            w_hh = layer_refs[3 * l + 1][...]     # [H, 4H]
            b = layer_refs[3 * l + 2][...]        # [1, 4H]

            # --- Hoisted input projection (one MXU matmul for the whole sequence) ---
            # Layer 0 reads the embedded input; deeper layers read the previous layer's
            # hidden sequence (seq_ref has been fully written by the previous layer).
            x_in = x_ref[...] if l == 0 else seq_ref[...]           # [T*B, in]
            gx = jnp.dot(x_in, w_ih, preferred_element_type=jnp.float32) + b   # [T*B, 4H]

            # --- Serial recurrence (statically unrolled) ---
            h = None
            c = None
            for t in range(T):
                gx_t = gx[t * B:(t + 1) * B, :]                      # [B, 4H] static slice
                if h is None:                                        # t == 0: h0 = 0
                    gates = gx_t
                else:
                    gates = gx_t + jnp.dot(h, w_hh,
                                           preferred_element_type=jnp.float32)
                # Full-width nonlinearities on the [B, 4H] vreg, then static gate slices.
                sig = jax.nn.sigmoid(gates)
                tnh = jnp.tanh(gates)
                i_g = sig[:, 0 * H:1 * H]
                f_g = sig[:, 1 * H:2 * H]
                g_g = tnh[:, 2 * H:3 * H]
                o_g = sig[:, 3 * H:4 * H]
                if c is None:                                        # t == 0: c0 = 0
                    c = i_g * g_g
                else:
                    c = f_g * c + i_g * g_g
                h = o_g * jnp.tanh(c)
                if l < L - 1:                                        # top layer: no writeback
                    seq_ref[t * B:(t + 1) * B, :] = h
            h_last = h

        # fc(lstm_out[:, -1, :]) == fc(h_last of top layer)
        out = jnp.dot(h_last, fc_w_ref[...],
                      preferred_element_type=jnp.float32) + fc_b_ref[...]
        out_ref[...] = out.astype(out_ref.dtype)

    return kernel


# -----------------------------------------------------------------------------
# One-time parameter packing (kernel layout) — NOT in the per-call path
# -----------------------------------------------------------------------------
def pack_params(params):
    packed = {
        "embedding": params["embedding"].astype(jnp.float32),
        "layers": [],
        "fc_w": jnp.transpose(params["fc_w"]).astype(jnp.float32),      # [H, O]
        "fc_b": params["fc_b"][None, :].astype(jnp.float32),            # [1, O]
    }
    for l in range(len(params["w_ih"])):
        packed["layers"].append((
            jnp.transpose(params["w_ih"][l]).astype(jnp.float32),       # [in, 4H]
            jnp.transpose(params["w_hh"][l]).astype(jnp.float32),       # [H, 4H]
            (params["b_ih"][l] + params["b_hh"][l])[None, :].astype(jnp.float32),  # [1, 4H]
        ))
    return packed


# -----------------------------------------------------------------------------
# Wrapper: time-major flat embedding gather + single pallas_call
# -----------------------------------------------------------------------------
def lstm_emotion_forward(token_ids, packed):
    B, T = token_ids.shape
    emb_table = packed["embedding"]
    E = emb_table.shape[1]
    L = len(packed["layers"])
    H = packed["layers"][0][1].shape[0]
    O = packed["fc_w"].shape[1]

    # Gather directly in time-major flat order: row t*B + b  ->  [T*B, E].
    flat_ids = jnp.transpose(token_ids).reshape(-1)
    x2d = jnp.take(emb_table, flat_ids, axis=0)                         # [T*B, E]

    inputs = [x2d]
    for (w_ih, w_hh, b) in packed["layers"]:
        inputs.extend([w_ih, w_hh, b])
    inputs.extend([packed["fc_w"], packed["fc_b"]])

    kernel = make_lstm_kernel(B, T, E, H, O, L)
    out = pl.pallas_call(
        kernel,
        out_shape=jax.ShapeDtypeStruct((B, O), jnp.float32),
        in_specs=[pl.BlockSpec(memory_space=pltpu.MemorySpace.VMEM)] * len(inputs),
        out_specs=pl.BlockSpec(memory_space=pltpu.MemorySpace.VMEM),
        scratch_shapes=[pltpu.VMEM((T * B, H), jnp.float32)],
    )(*inputs)
    return out


# -----------------------------------------------------------------------------
# Pure-JAX reference (mirrors torch.nn.LSTM semantics, gate order i,f,g,o)
# -----------------------------------------------------------------------------
def reference_forward(token_ids, params):
    x = params["embedding"][token_ids].astype(jnp.float32)     # [B, T, E]
    B = x.shape[0]
    L = len(params["w_ih"])
    for l in range(L):
        H = params["w_hh"][l].shape[1]
        w_ih, w_hh = params["w_ih"][l], params["w_hh"][l]
        b = params["b_ih"][l] + params["b_hh"][l]

        def step(carry, x_t):
            h, c = carry
            gates = x_t @ w_ih.T + h @ w_hh.T + b
            i, f, g, o = jnp.split(gates, 4, axis=-1)
            i, f, o = jax.nn.sigmoid(i), jax.nn.sigmoid(f), jax.nn.sigmoid(o)
            g = jnp.tanh(g)
            c = f * c + i * g
            h = o * jnp.tanh(c)
            return (h, c), h

        h0 = jnp.zeros((B, H), jnp.float32)
        c0 = jnp.zeros((B, H), jnp.float32)
        _, hs = lax.scan(step, (h0, c0), jnp.transpose(x, (1, 0, 2)))
        x = jnp.transpose(hs, (1, 0, 2))
    last = x[:, -1, :]
    return last @ params["fc_w"].T + params["fc_b"]


# -----------------------------------------------------------------------------
# Deterministic parameter construction (matches PyTorch module shapes)
# -----------------------------------------------------------------------------
def init_params(key, vocab_size, embedding_dim, hidden_dim, output_dim, num_layers):
    keys = jax.random.split(key, 3 + 4 * num_layers)
    k = 1.0 / jnp.sqrt(hidden_dim)

    params = {
        "embedding": jax.random.normal(keys[0], (vocab_size, embedding_dim), jnp.float32),
        "w_ih": [], "w_hh": [], "b_ih": [], "b_hh": [],
    }
    for l in range(num_layers):
        in_dim = embedding_dim if l == 0 else hidden_dim
        kk = keys[1 + 4 * l: 1 + 4 * (l + 1)]
        params["w_ih"].append(jax.random.uniform(kk[0], (4 * hidden_dim, in_dim), jnp.float32, -k, k))
        params["w_hh"].append(jax.random.uniform(kk[1], (4 * hidden_dim, hidden_dim), jnp.float32, -k, k))
        params["b_ih"].append(jax.random.uniform(kk[2], (4 * hidden_dim,), jnp.float32, -k, k))
        params["b_hh"].append(jax.random.uniform(kk[3], (4 * hidden_dim,), jnp.float32, -k, k))
    params["fc_w"] = jax.random.uniform(keys[-2], (output_dim, hidden_dim), jnp.float32, -k, k)
    params["fc_b"] = jax.random.uniform(keys[-1], (output_dim,), jnp.float32, -k, k)
    return params


if __name__ == "__main__":
    # Small shapes consistent with the module's forward:
    # x: int token ids [batch=2, seq=8]; vocab=100, embedding_dim=32,
    # hidden_dim=32, output_dim=4, num_layers=2.
    VOCAB, EMB, HID, OUT, LAYERS = 100, 32, 32, 4, 2
    B, T = 2, 8

    key = jax.random.PRNGKey(0)
    pkey, xkey = jax.random.split(key)
    params = init_params(pkey, VOCAB, EMB, HID, OUT, LAYERS)
    token_ids = jax.random.randint(xkey, (B, T), 0, VOCAB, dtype=jnp.int32)

    # Weight packing happens ONCE, outside the per-call path.
    packed = pack_params(params)

    fwd = jax.jit(lstm_emotion_forward)
    out = jax.block_until_ready(fwd(token_ids, packed))

    ref = jax.block_until_ready(reference_forward(token_ids, params))
    assert out.shape == (B, OUT)
    assert jnp.allclose(out, ref, atol=1e-4, rtol=1e-4), (out, ref)

    print("KERNEL_OK")
</pallas_src>

<mosaic_0001>
module attributes {stable_mosaic.version = 11 : i64} {
  func.func @kernel(%arg0: memref<16x32xf32, #tpu.memory_space<vmem>>, %arg1: memref<32x128xf32, #tpu.memory_space<vmem>>, %arg2: memref<32x128xf32, #tpu.memory_space<vmem>>, %arg3: memref<1x128xf32, #tpu.memory_space<vmem>>, %arg4: memref<32x128xf32, #tpu.memory_space<vmem>>, %arg5: memref<32x128xf32, #tpu.memory_space<vmem>>, %arg6: memref<1x128xf32, #tpu.memory_space<vmem>>, %arg7: memref<32x4xf32, #tpu.memory_space<vmem>>, %arg8: memref<1x4xf32, #tpu.memory_space<vmem>>, %arg9: memref<2x4xf32, #tpu.memory_space<vmem>>, %arg10: memref<16x32xf32, #tpu.memory_space<vmem>>) attributes {dimension_semantics = [], scalar_prefetch = 0 : i64, scratch_operands = 1 : i64, tpu.core_type = #tpu.core_type<tc>} {
    %c0 = arith.constant 0 : index
    %c0_0 = arith.constant 0 : index
    %0 = vector.load %arg1[%c0, %c0_0] : memref<32x128xf32, #tpu.memory_space<vmem>>, vector<32x128xf32>
    %c0_1 = arith.constant 0 : index
    %c0_2 = arith.constant 0 : index
    %1 = vector.load %arg2[%c0_1, %c0_2] : memref<32x128xf32, #tpu.memory_space<vmem>>, vector<32x128xf32>
    %c0_3 = arith.constant 0 : index
    %c0_4 = arith.constant 0 : index
    %2 = vector.load %arg3[%c0_3, %c0_4] : memref<1x128xf32, #tpu.memory_space<vmem>>, vector<1x128xf32>
    %c0_5 = arith.constant 0 : index
    %c0_6 = arith.constant 0 : index
    %3 = vector.load %arg0[%c0_5, %c0_6] : memref<16x32xf32, #tpu.memory_space<vmem>>, vector<16x32xf32>
    %cst = arith.constant dense<0.000000e+00> : vector<16x128xf32>
    %4 = tpu.matmul %3, %0, %cst {dimension_numbers = #tpu.dot_dimension_numbers<[1], [0], [0], [1], [0, 0, 1, 1], [], []>} : vector<16x32xf32>, vector<32x128xf32>, vector<16x128xf32> -> vector<16x128xf32>
    %5 = vector.broadcast %2 : vector<1x128xf32> to vector<16x128xf32>
    %6 = arith.addf %4, %5 : vector<16x128xf32>
    %7 = vector.extract_strided_slice %6 {offsets = [0, 0], sizes = [2, 128], strides = [1, 1]} : vector<16x128xf32> to vector<2x128xf32>
    %8 = arith.negf %7 : vector<2x128xf32>
    %9 = math.exp %8 : vector<2x128xf32>
    %cst_7 = arith.constant 1.000000e+00 : f32
    %10 = vector.broadcast %cst_7 : f32 to vector<2x128xf32>
    %11 = arith.addf %10, %9 : vector<2x128xf32>
    %12 = arith.divf %10, %11 : vector<2x128xf32>
    %13 = math.tanh %7 : vector<2x128xf32>
    %14 = vector.extract_strided_slice %12 {offsets = [0, 0], sizes = [2, 32], strides = [1, 1]} : vector<2x128xf32> to vector<2x32xf32>
    %15 = vector.extract_strided_slice %13 {offsets = [0, 64], sizes = [2, 32], strides = [1, 1]} : vector<2x128xf32> to vector<2x32xf32>
    %16 = vector.extract_strided_slice %12 {offsets = [0, 96], sizes = [2, 32], strides = [1, 1]} : vector<2x128xf32> to vector<2x32xf32>
    %17 = arith.mulf %14, %15 : vector<2x32xf32>
    %18 = math.tanh %17 : vector<2x32xf32>
    %19 = arith.mulf %16, %18 : vector<2x32xf32>
    %c0_8 = arith.constant 0 : index
    %c0_9 = arith.constant 0 : index
    %20 = vector.load %arg10[%c0_8, %c0_9] : memref<16x32xf32, #tpu.memory_space<vmem>>, vector<2x32xf32>
    tpu.vector_store %arg10[%c0_8, %c0_9], %19 {strides = array<i32>} : memref<16x32xf32, #tpu.memory_space<vmem>>, vector<2x32xf32>,
    %21 = vector.extract_strided_slice %6 {offsets = [2, 0], sizes = [2, 128], strides = [1, 1]} : vector<16x128xf32> to vector<2x128xf32>
    %cst_10 = arith.constant dense<0.000000e+00> : vector<2x128xf32>
    %22 = tpu.matmul %19, %1, %cst_10 {dimension_numbers = #tpu.dot_dimension_numbers<[1], [0], [0], [1], [0, 0, 1, 1], [], []>} : vector<2x32xf32>, vector<32x128xf32>, vector<2x128xf32> -> vector<2x128xf32>
    %23 = arith.addf %21, %22 : vector<2x128xf32>
    %24 = arith.negf %23 : vector<2x128xf32>
    %25 = math.exp %24 : vector<2x128xf32>
    %cst_11 = arith.constant 1.000000e+00 : f32
    %26 = vector.broadcast %cst_11 : f32 to vector<2x128xf32>
    %27 = arith.addf %26, %25 : vector<2x128xf32>
    %28 = arith.divf %26, %27 : vector<2x128xf32>
    %29 = math.tanh %23 : vector<2x128xf32>
    %30 = vector.extract_strided_slice %28 {offsets = [0, 0], sizes = [2, 32], strides = [1, 1]} : vector<2x128xf32> to vector<2x32xf32>
    %31 = vector.extract_strided_slice %28 {offsets = [0, 32], sizes = [2, 32], strides = [1, 1]} : vector<2x128xf32> to vector<2x32xf32>
    %32 = vector.extract_strided_slice %29 {offsets = [0, 64], sizes = [2, 32], strides = [1, 1]} : vector<2x128xf32> to vector<2x32xf32>
    %33 = vector.extract_strided_slice %28 {offsets = [0, 96], sizes = [2, 32], strides = [1, 1]} : vector<2x128xf32> to vector<2x32xf32>
    %34 = arith.mulf %31, %17 : vector<2x32xf32>
    %35 = arith.mulf %30, %32 : vector<2x32xf32>
    %36 = arith.addf %34, %35 : vector<2x32xf32>
    %37 = math.tanh %36 : vector<2x32xf32>
    %38 = arith.mulf %33, %37 : vector<2x32xf32>
    %c2 = arith.constant 2 : index
    %c0_12 = arith.constant 0 : index
    %39 = vector.load %arg10[%c2, %c0_12] : memref<16x32xf32, #tpu.memory_space<vmem>>, vector<2x32xf32>
    tpu.vector_store %arg10[%c2, %c0_12], %38 {strides = array<i32>} : memref<16x32xf32, #tpu.memory_space<vmem>>, vector<2x32xf32>,
    %40 = vector.extract_strided_slice %6 {offsets = [4, 0], sizes = [2, 128], strides = [1, 1]} : vector<16x128xf32> to vector<2x128xf32>
    %cst_13 = arith.constant dense<0.000000e+00> : vector<2x128xf32>
    %41 = tpu.matmul %38, %1, %cst_13 {dimension_numbers = #tpu.dot_dimension_numbers<[1], [0], [0], [1], [0, 0, 1, 1], [], []>} : vector<2x32xf32>, vector<32x128xf32>, vector<2x128xf32> -> vector<2x128xf32>
    %42 = arith.addf %40, %41 : vector<2x128xf32>
    %43 = arith.negf %42 : vector<2x128xf32>
    %44 = math.exp %43 : vector<2x128xf32>
    %cst_14 = arith.constant 1.000000e+00 : f32
    %45 = vector.broadcast %cst_14 : f32 to vector<2x128xf32>
    %46 = arith.addf %45, %44 : vector<2x128xf32>
    %47 = arith.divf %45, %46 : vector<2x128xf32>
    %48 = math.tanh %42 : vector<2x128xf32>
    %49 = vector.extract_strided_slice %47 {offsets = [0, 0], sizes = [2, 32], strides = [1, 1]} : vector<2x128xf32> to vector<2x32xf32>
    %50 = vector.extract_strided_slice %47 {offsets = [0, 32], sizes = [2, 32], strides = [1, 1]} : vector<2x128xf32> to vector<2x32xf32>
    %51 = vector.extract_strided_slice %48 {offsets = [0, 64], sizes = [2, 32], strides = [1, 1]} : vector<2x128xf32> to vector<2x32xf32>
    %52 = vector.extract_strided_slice %47 {offsets = [0, 96], sizes = [2, 32], strides = [1, 1]} : vector<2x128xf32> to vector<2x32xf32>
    %53 = arith.mulf %50, %36 : vector<2x32xf32>
    %54 = arith.mulf %49, %51 : vector<2x32xf32>
    %55 = arith.addf %53, %54 : vector<2x32xf32>
    %56 = math.tanh %55 : vector<2x32xf32>
    %57 = arith.mulf %52, %56 : vector<2x32xf32>
    %c4 = arith.constant 4 : index
    %c0_15 = arith.constant 0 : index
    %58 = vector.load %arg10[%c4, %c0_15] : memref<16x32xf32, #tpu.memory_space<vmem>>, vector<2x32xf32>
    tpu.vector_store %arg10[%c4, %c0_15], %57 {strides = array<i32>} : memref<16x32xf32, #tpu.memory_space<vmem>>, vector<2x32xf32>,
    %59 = vector.extract_strided_slice %6 {offsets = [6, 0], sizes = [2, 128], strides = [1, 1]} : vector<16x128xf32> to vector<2x128xf32>
    %cst_16 = arith.constant dense<0.000000e+00> : vector<2x128xf32>
    %60 = tpu.matmul %57, %1, %cst_16 {dimension_numbers = #tpu.dot_dimension_numbers<[1], [0], [0], [1], [0, 0, 1, 1], [], []>} : vector<2x32xf32>, vector<32x128xf32>, vector<2x128xf32> -> vector<2x128xf32>
    %61 = arith.addf %59, %60 : vector<2x128xf32>
    %62 = arith.negf %61 : vector<2x128xf32>
    %63 = math.exp %62 : vector<2x128xf32>
    %cst_17 = arith.constant 1.000000e+00 : f32
    %64 = vector.broadcast %cst_17 : f32 to vector<2x128xf32>
    %65 = arith.addf %64, %63 : vector<2x128xf32>
    %66 = arith.divf %64, %65 : vector<2x128xf32>
    %67 = math.tanh %61 : vector<2x128xf32>
    %68 = vector.extract_strided_slice %66 {offsets = [0, 0], sizes = [2, 32], strides = [1, 1]} : vector<2x128xf32> to vector<2x32xf32>
    %69 = vector.extract_strided_slice %66 {offsets = [0, 32], sizes = [2, 32], strides = [1, 1]} : vector<2x128xf32> to vector<2x32xf32>
    %70 = vector.extract_strided_slice %67 {offsets = [0, 64], sizes = [2, 32], strides = [1, 1]} : vector<2x128xf32> to vector<2x32xf32>
    %71 = vector.extract_strided_slice %66 {offsets = [0, 96], sizes = [2, 32], strides = [1, 1]} : vector<2x128xf32> to vector<2x32xf32>
    %72 = arith.mulf %69, %55 : vector<2x32xf32>
    %73 = arith.mulf %68, %70 : vector<2x32xf32>
    %74 = arith.addf %72, %73 : vector<2x32xf32>
    %75 = math.tanh %74 : vector<2x32xf32>
    %76 = arith.mulf %71, %75 : vector<2x32xf32>
    %c6 = arith.constant 6 : index
    %c0_18 = arith.constant 0 : index
    %77 = vector.load %arg10[%c6, %c0_18] : memref<16x32xf32, #tpu.memory_space<vmem>>, vector<2x32xf32>
    tpu.vector_store %arg10[%c6, %c0_18], %76 {strides = array<i32>} : memref<16x32xf32, #tpu.memory_space<vmem>>, vector<2x32xf32>,
    %78 = vector.extract_strided_slice %6 {offsets = [8, 0], sizes = [2, 128], strides = [1, 1]} : vector<16x128xf32> to vector<2x128xf32>
    %cst_19 = arith.constant dense<0.000000e+00> : vector<2x128xf32>
    %79 = tpu.matmul %76, %1, %cst_19 {dimension_numbers = #tpu.dot_dimension_numbers<[1], [0], [0], [1], [0, 0, 1, 1], [], []>} : vector<2x32xf32>, vector<32x128xf32>, vector<2x128xf32> -> vector<2x128xf32>
    %80 = arith.addf %78, %79 : vector<2x128xf32>
    %81 = arith.negf %80 : vector<2x128xf32>
    %82 = math.exp %81 : vector<2x128xf32>
    %cst_20 = arith.constant 1.000000e+00 : f32
    %83 = vector.broadcast %cst_20 : f32 to vector<2x128xf32>
    %84 = arith.addf %83, %82 : vector<2x128xf32>
    %85 = arith.divf %83, %84 : vector<2x128xf32>
    %86 = math.tanh %80 : vector<2x128xf32>
    %87 = vector.extract_strided_slice %85 {offsets = [0, 0], sizes = [2, 32], strides = [1, 1]} : vector<2x128xf32> to vector<2x32xf32>
    %88 = vector.extract_strided_slice %85 {offsets = [0, 32], sizes = [2, 32], strides = [1, 1]} : vector<2x128xf32> to vector<2x32xf32>
    %89 = vector.extract_strided_slice %86 {offsets = [0, 64], sizes = [2, 32], strides = [1, 1]} : vector<2x128xf32> to vector<2x32xf32>
    %90 = vector.extract_strided_slice %85 {offsets = [0, 96], sizes = [2, 32], strides = [1, 1]} : vector<2x128xf32> to vector<2x32xf32>
    %91 = arith.mulf %88, %74 : vector<2x32xf32>
    %92 = arith.mulf %87, %89 : vector<2x32xf32>
    %93 = arith.addf %91, %92 : vector<2x32xf32>
    %94 = math.tanh %93 : vector<2x32xf32>
    %95 = arith.mulf %90, %94 : vector<2x32xf32>
    %c8 = arith.constant 8 : index
    %c0_21 = arith.constant 0 : index
    %96 = vector.load %arg10[%c8, %c0_21] : memref<16x32xf32, #tpu.memory_space<vmem>>, vector<2x32xf32>
    tpu.vector_store %arg10[%c8, %c0_21], %95 {strides = array<i32>} : memref<16x32xf32, #tpu.memory_space<vmem>>, vector<2x32xf32>,
    %97 = vector.extract_strided_slice %6 {offsets = [10, 0], sizes = [2, 128], strides = [1, 1]} : vector<16x128xf32> to vector<2x128xf32>
    %cst_22 = arith.constant dense<0.000000e+00> : vector<2x128xf32>
    %98 = tpu.matmul %95, %1, %cst_22 {dimension_numbers = #tpu.dot_dimension_numbers<[1], [0], [0], [1], [0, 0, 1, 1], [], []>} : vector<2x32xf32>, vector<32x128xf32>, vector<2x128xf32> -> vector<2x128xf32>
    %99 = arith.addf %97, %98 : vector<2x128xf32>
    %100 = arith.negf %99 : vector<2x128xf32>
    %101 = math.exp %100 : vector<2x128xf32>
    %cst_23 = arith.constant 1.000000e+00 : f32
    %102 = vector.broadcast %cst_23 : f32 to vector<2x128xf32>
    %103 = arith.addf %102, %101 : vector<2x128xf32>
    %104 = arith.divf %102, %103 : vector<2x128xf32>
    %105 = math.tanh %99 : vector<2x128xf32>
    %106 = vector.extract_strided_slice %104 {offsets = [0, 0], sizes = [2, 32], strides = [1, 1]} : vector<2x128xf32> to vector<2x32xf32>
    %107 = vector.extract_strided_slice %104 {offsets = [0, 32], sizes = [2, 32], strides = [1, 1]} : vector<2x128xf32> to vector<2x32xf32>
    %108 = vector.extract_strided_slice %105 {offsets = [0, 64], sizes = [2, 32], strides = [1, 1]} : vector<2x128xf32> to vector<2x32xf32>
    %109 = vector.extract_strided_slice %104 {offsets = [0, 96], sizes = [2, 32], strides = [1, 1]} : vector<2x128xf32> to vector<2x32xf32>
    %110 = arith.mulf %107, %93 : vector<2x32xf32>
    %111 = arith.mulf %106, %108 : vector<2x32xf32>
    %112 = arith.addf %110, %111 : vector<2x32xf32>
    %113 = math.tanh %112 : vector<2x32xf32>
    %114 = arith.mulf %109, %113 : vector<2x32xf32>
    %c10 = arith.constant 10 : index
    %c0_24 = arith.constant 0 : index
    %115 = vector.load %arg10[%c10, %c0_24] : memref<16x32xf32, #tpu.memory_space<vmem>>, vector<2x32xf32>
    tpu.vector_store %arg10[%c10, %c0_24], %114 {strides = array<i32>} : memref<16x32xf32, #tpu.memory_space<vmem>>, vector<2x32xf32>,
    %116 = vector.extract_strided_slice %6 {offsets = [12, 0], sizes = [2, 128], strides = [1, 1]} : vector<16x128xf32> to vector<2x128xf32>
    %cst_25 = arith.constant dense<0.000000e+00> : vector<2x128xf32>
    %117 = tpu.matmul %114, %1, %cst_25 {dimension_numbers = #tpu.dot_dimension_numbers<[1], [0], [0], [1], [0, 0, 1, 1], [], []>} : vector<2x32xf32>, vector<32x128xf32>, vector<2x128xf32> -> vector<2x128xf32>
    %118 = arith.addf %116, %117 : vector<2x128xf32>
    %119 = arith.negf %118 : vector<2x128xf32>
    %120 = math.exp %119 : vector<2x128xf32>
    %cst_26 = arith.constant 1.000000e+00 : f32
    %121 = vector.broadcast %cst_26 : f32 to vector<2x128xf32>
    %122 = arith.addf %121, %120 : vector<2x128xf32>
    %123 = arith.divf %121, %122 : vector<2x128xf32>
    %124 = math.tanh %118 : vector<2x128xf32>
    %125 = vector.extract_strided_slice %123 {offsets = [0, 0], sizes = [2, 32], strides = [1, 1]} : vector<2x128xf32> to vector<2x32xf32>
    %126 = vector.extract_strided_slice %123 {offsets = [0, 32], sizes = [2, 32], strides = [1, 1]} : vector<2x128xf32> to vector<2x32xf32>
    %127 = vector.extract_strided_slice %124 {offsets = [0, 64], sizes = [2, 32], strides = [1, 1]} : vector<2x128xf32> to vector<2x32xf32>
    %128 = vector.extract_strided_slice %123 {offsets = [0, 96], sizes = [2, 32], strides = [1, 1]} : vector<2x128xf32> to vector<2x32xf32>
    %129 = arith.mulf %126, %112 : vector<2x32xf32>
    %130 = arith.mulf %125, %127 : vector<2x32xf32>
    %131 = arith.addf %129, %130 : vector<2x32xf32>
    %132 = math.tanh %131 : vector<2x32xf32>
    %133 = arith.mulf %128, %132 : vector<2x32xf32>
    %c12 = arith.constant 12 : index
    %c0_27 = arith.constant 0 : index
    %134 = vector.load %arg10[%c12, %c0_27] : memref<16x32xf32, #tpu.memory_space<vmem>>, vector<2x32xf32>
    tpu.vector_store %arg10[%c12, %c0_27], %133 {strides = array<i32>} : memref<16x32xf32, #tpu.memory_space<vmem>>, vector<2x32xf32>,
    %135 = vector.extract_strided_slice %6 {offsets = [14, 0], sizes = [2, 128], strides = [1, 1]} : vector<16x128xf32> to vector<2x128xf32>
    %cst_28 = arith.constant dense<0.000000e+00> : vector<2x128xf32>
    %136 = tpu.matmul %133, %1, %cst_28 {dimension_numbers = #tpu.dot_dimension_numbers<[1], [0], [0], [1], [0, 0, 1, 1], [], []>} : vector<2x32xf32>, vector<32x128xf32>, vector<2x128xf32> -> vector<2x128xf32>
    %137 = arith.addf %135, %136 : vector<2x128xf32>
    %138 = arith.negf %137 : vector<2x128xf32>
    %139 = math.exp %138 : vector<2x128xf32>
    %cst_29 = arith.constant 1.000000e+00 : f32
    %140 = vector.broadcast %cst_29 : f32 to vector<2x128xf32>
    %141 = arith.addf %140, %139 : vector<2x128xf32>
    %142 = arith.divf %140, %141 : vector<2x128xf32>
    %143 = math.tanh %137 : vector<2x128xf32>
    %144 = vector.extract_strided_slice %142 {offsets = [0, 0], sizes = [2, 32], strides = [1, 1]} : vector<2x128xf32> to vector<2x32xf32>
    %145 = vector.extract_strided_slice %142 {offsets = [0, 32], sizes = [2, 32], strides = [1, 1]} : vector<2x128xf32> to vector<2x32xf32>
    %146 = vector.extract_strided_slice %143 {offsets = [0, 64], sizes = [2, 32], strides = [1, 1]} : vector<2x128xf32> to vector<2x32xf32>
    %147 = vector.extract_strided_slice %142 {offsets = [0, 96], sizes = [2, 32], strides = [1, 1]} : vector<2x128xf32> to vector<2x32xf32>
    %148 = arith.mulf %145, %131 : vector<2x32xf32>
    %149 = arith.mulf %144, %146 : vector<2x32xf32>
    %150 = arith.addf %148, %149 : vector<2x32xf32>
    %151 = math.tanh %150 : vector<2x32xf32>
    %152 = arith.mulf %147, %151 : vector<2x32xf32>
    %c14 = arith.constant 14 : index
    %c0_30 = arith.constant 0 : index
    %153 = vector.load %arg10[%c14, %c0_30] : memref<16x32xf32, #tpu.memory_space<vmem>>, vector<2x32xf32>
    tpu.vector_store %arg10[%c14, %c0_30], %152 {strides = array<i32>} : memref<16x32xf32, #tpu.memory_space<vmem>>, vector<2x32xf32>,
    %c0_31 = arith.constant 0 : index
    %c0_32 = arith.constant 0 : index
    %154 = vector.load %arg4[%c0_31, %c0_32] : memref<32x128xf32, #tpu.memory_space<vmem>>, vector<32x128xf32>
    %c0_33 = arith.constant 0 : index
    %c0_34 = arith.constant 0 : index
    %155 = vector.load %arg5[%c0_33, %c0_34] : memref<32x128xf32, #tpu.memory_space<vmem>>, vector<32x128xf32>
    %c0_35 = arith.constant 0 : index
    %c0_36 = arith.constant 0 : index
    %156 = vector.load %arg6[%c0_35, %c0_36] : memref<1x128xf32, #tpu.memory_space<vmem>>, vector<1x128xf32>
    %c0_37 = arith.constant 0 : index
    %c0_38 = arith.constant 0 : index
    %157 = vector.load %arg10[%c0_37, %c0_38] : memref<16x32xf32, #tpu.memory_space<vmem>>, vector<16x32xf32>
    %cst_39 = arith.constant dense<0.000000e+00> : vector<16x128xf32>
    %158 = tpu.matmul %157, %154, %cst_39 {dimension_numbers = #tpu.dot_dimension_numbers<[1], [0], [0], [1], [0, 0, 1, 1], [], []>} : vector<16x32xf32>, vector<32x128xf32>, vector<16x128xf32> -> vector<16x128xf32>
    %159 = vector.broadcast %156 : vector<1x128xf32> to vector<16x128xf32>
    %160 = arith.addf %158, %159 : vector<16x128xf32>
    %161 = vector.extract_strided_slice %160 {offsets = [0, 0], sizes = [2, 128], strides = [1, 1]} : vector<16x128xf32> to vector<2x128xf32>
    %162 = arith.negf %161 : vector<2x128xf32>
    %163 = math.exp %162 : vector<2x128xf32>
    %cst_40 = arith.constant 1.000000e+00 : f32
    %164 = vector.broadcast %cst_40 : f32 to vector<2x128xf32>
    %165 = arith.addf %164, %163 : vector<2x128xf32>
    %166 = arith.divf %164, %165 : vector<2x128xf32>
    %167 = math.tanh %161 : vector<2x128xf32>
    %168 = vector.extract_strided_slice %166 {offsets = [0, 0], sizes = [2, 32], strides = [1, 1]} : vector<2x128xf32> to vector<2x32xf32>
    %169 = vector.extract_strided_slice %167 {offsets = [0, 64], sizes = [2, 32], strides = [1, 1]} : vector<2x128xf32> to vector<2x32xf32>
    %170 = vector.extract_strided_slice %166 {offsets = [0, 96], sizes = [2, 32], strides = [1, 1]} : vector<2x128xf32> to vector<2x32xf32>
    %171 = arith.mulf %168, %169 : vector<2x32xf32>
    %172 = math.tanh %171 : vector<2x32xf32>
    %173 = arith.mulf %170, %172 : vector<2x32xf32>
    %174 = vector.extract_strided_slice %160 {offsets = [2, 0], sizes = [2, 128], strides = [1, 1]} : vector<16x128xf32> to vector<2x128xf32>
    %cst_41 = arith.constant dense<0.000000e+00> : vector<2x128xf32>
    %175 = tpu.matmul %173, %155, %cst_41 {dimension_numbers = #tpu.dot_dimension_numbers<[1], [0], [0], [1], [0, 0, 1, 1], [], []>} : vector<2x32xf32>, vector<32x128xf32>, vector<2x128xf32> -> vector<2x128xf32>
    %176 = arith.addf %174, %175 : vector<2x128xf32>
    %177 = arith.negf %176 : vector<2x128xf32>
    %178 = math.exp %177 : vector<2x128xf32>
    %cst_42 = arith.constant 1.000000e+00 : f32
    %179 = vector.broadcast %cst_42 : f32 to vector<2x128xf32>
    %180 = arith.addf %179, %178 : vector<2x128xf32>
    %181 = arith.divf %179, %180 : vector<2x128xf32>
    %182 = math.tanh %176 : vector<2x128xf32>
    %183 = vector.extract_strided_slice %181 {offsets = [0, 0], sizes = [2, 32], strides = [1, 1]} : vector<2x128xf32> to vector<2x32xf32>
    %184 = vector.extract_strided_slice %181 {offsets = [0, 32], sizes = [2, 32], strides = [1, 1]} : vector<2x128xf32> to vector<2x32xf32>
    %185 = vector.extract_strided_slice %182 {offsets = [0, 64], sizes = [2, 32], strides = [1, 1]} : vector<2x128xf32> to vector<2x32xf32>
    %186 = vector.extract_strided_slice %181 {offsets = [0, 96], sizes = [2, 32], strides = [1, 1]} : vector<2x128xf32> to vector<2x32xf32>
    %187 = arith.mulf %184, %171 : vector<2x32xf32>
    %188 = arith.mulf %183, %185 : vector<2x32xf32>
    %189 = arith.addf %187, %188 : vector<2x32xf32>
    %190 = math.tanh %189 : vector<2x32xf32>
    %191 = arith.mulf %186, %190 : vector<2x32xf32>
    %192 = vector.extract_strided_slice %160 {offsets = [4, 0], sizes = [2, 128], strides = [1, 1]} : vector<16x128xf32> to vector<2x128xf32>
    %cst_43 = arith.constant dense<0.000000e+00> : vector<2x128xf32>
    %193 = tpu.matmul %191, %155, %cst_43 {dimension_numbers = #tpu.dot_dimension_numbers<[1], [0], [0], [1], [0, 0, 1, 1], [], []>} : vector<2x32xf32>, vector<32x128xf32>, vector<2x128xf32> -> vector<2x128xf32>
    %194 = arith.addf %192, %193 : vector<2x128xf32>
    %195 = arith.negf %194 : vector<2x128xf32>
    %196 = math.exp %195 : vector<2x128xf32>
    %cst_44 = arith.constant 1.000000e+00 : f32
    %197 = vector.broadcast %cst_44 : f32 to vector<2x128xf32>
    %198 = arith.addf %197, %196 : vector<2x128xf32>
    %199 = arith.divf %197, %198 : vector<2x128xf32>
    %200 = math.tanh %194 : vector<2x128xf32>
    %201 = vector.extract_strided_slice %199 {offsets = [0, 0], sizes = [2, 32], strides = [1, 1]} : vector<2x128xf32> to vector<2x32xf32>
    %202 = vector.extract_strided_slice %199 {offsets = [0, 32], sizes = [2, 32], strides = [1, 1]} : vector<2x128xf32> to vector<2x32xf32>
    %203 = vector.extract_strided_slice %200 {offsets = [0, 64], sizes = [2, 32], strides = [1, 1]} : vector<2x128xf32> to vector<2x32xf32>
    %204 = vector.extract_strided_slice %199 {offsets = [0, 96], sizes = [2, 32], strides = [1, 1]} : vector<2x128xf32> to vector<2x32xf32>
    %205 = arith.mulf %202, %189 : vector<2x32xf32>
    %206 = arith.mulf %201, %203 : vector<2x32xf32>
    %207 = arith.addf %205, %206 : vector<2x32xf32>
    %208 = math.tanh %207 : vector<2x32xf32>
    %209 = arith.mulf %204, %208 : vector<2x32xf32>
    %210 = vector.extract_strided_slice %160 {offsets = [6, 0], sizes = [2, 128], strides = [1, 1]} : vector<16x128xf32> to vector<2x128xf32>
    %cst_45 = arith.constant dense<0.000000e+00> : vector<2x128xf32>
    %211 = tpu.matmul %209, %155, %cst_45 {dimension_numbers = #tpu.dot_dimension_numbers<[1], [0], [0], [1], [0, 0, 1, 1], [], []>} : vector<2x32xf32>, vector<32x128xf32>, vector<2x128xf32> -> vector<2x128xf32>
    %212 = arith.addf %210, %211 : vector<2x128xf32>
    %213 = arith.negf %212 : vector<2x128xf32>
    %214 = math.exp %213 : vector<2x128xf32>
    %cst_46 = arith.constant 1.000000e+00 : f32
    %215 = vector.broadcast %cst_46 : f32 to vector<2x128xf32>
    %216 = arith.addf %215, %214 : vector<2x128xf32>
    %217 = arith.divf %215, %216 : vector<2x128xf32>
    %218 = math.tanh %212 : vector<2x128xf32>
    %219 = vector.extract_strided_slice %217 {offsets = [0, 0], sizes = [2, 32], strides = [1, 1]} : vector<2x128xf32> to vector<2x32xf32>
    %220 = vector.extract_strided_slice %217 {offsets = [0, 32], sizes = [2, 32], strides = [1, 1]} : vector<2x128xf32> to vector<2x32xf32>
    %221 = vector.extract_strided_slice %218 {offsets = [0, 64], sizes = [2, 32], strides = [1, 1]} : vector<2x128xf32> to vector<2x32xf32>
    %222 = vector.extract_strided_slice %217 {offsets = [0, 96], sizes = [2, 32], strides = [1, 1]} : vector<2x128xf32> to vector<2x32xf32>
    %223 = arith.mulf %220, %207 : vector<2x32xf32>
    %224 = arith.mulf %219, %221 : vector<2x32xf32>
    %225 = arith.addf %223, %224 : vector<2x32xf32>
    %226 = math.tanh %225 : vector<2x32xf32>
    %227 = arith.mulf %222, %226 : vector<2x32xf32>
    %228 = vector.extract_strided_slice %160 {offsets = [8, 0], sizes = [2, 128], strides = [1, 1]} : vector<16x128xf32> to vector<2x128xf32>
    %cst_47 = arith.constant dense<0.000000e+00> : vector<2x128xf32>
    %229 = tpu.matmul %227, %155, %cst_47 {dimension_numbers = #tpu.dot_dimension_numbers<[1], [0], [0], [1], [0, 0, 1, 1], [], []>} : vector<2x32xf32>, vector<32x128xf32>, vector<2x128xf32> -> vector<2x128xf32>
    %230 = arith.addf %228, %229 : vector<2x128xf32>
    %231 = arith.negf %230 : vector<2x128xf32>
    %232 = math.exp %231 : vector<2x128xf32>
    %cst_48 = arith.constant 1.000000e+00 : f32
    %233 = vector.broadcast %cst_48 : f32 to vector<2x128xf32>
    %234 = arith.addf %233, %232 : vector<2x128xf32>
    %235 = arith.divf %233, %234 : vector<2x128xf32>
    %236 = math.tanh %230 : vector<2x128xf32>
    %237 = vector.extract_strided_slice %235 {offsets = [0, 0], sizes = [2, 32], strides = [1, 1]} : vector<2x128xf32> to vector<2x32xf32>
    %238 = vector.extract_strided_slice %235 {offsets = [0, 32], sizes = [2, 32], strides = [1, 1]} : vector<2x128xf32> to vector<2x32xf32>
    %239 = vector.extract_strided_slice %236 {offsets = [0, 64], sizes = [2, 32], strides = [1, 1]} : vector<2x128xf32> to vector<2x32xf32>
    %240 = vector.extract_strided_slice %235 {offsets = [0, 96], sizes = [2, 32], strides = [1, 1]} : vector<2x128xf32> to vector<2x32xf32>
    %241 = arith.mulf %238, %225 : vector<2x32xf32>
    %242 = arith.mulf %237, %239 : vector<2x32xf32>
    %243 = arith.addf %241, %242 : vector<2x32xf32>
    %244 = math.tanh %243 : vector<2x32xf32>
    %245 = arith.mulf %240, %244 : vector<2x32xf32>
    %246 = vector.extract_strided_slice %160 {offsets = [10, 0], sizes = [2, 128], strides = [1, 1]} : vector<16x128xf32> to vector<2x128xf32>
    %cst_49 = arith.constant dense<0.000000e+00> : vector<2x128xf32>
    %247 = tpu.matmul %245, %155, %cst_49 {dimension_numbers = #tpu.dot_dimension_numbers<[1], [0], [0], [1], [0, 0, 1, 1], [], []>} : vector<2x32xf32>, vector<32x128xf32>, vector<2x128xf32> -> vector<2x128xf32>
    %248 = arith.addf %246, %247 : vector<2x128xf32>
    %249 = arith.negf %248 : vector<2x128xf32>
    %250 = math.exp %249 : vector<2x128xf32>
    %cst_50 = arith.constant 1.000000e+00 : f32
    %251 = vector.broadcast %cst_50 : f32 to vector<2x128xf32>
    %252 = arith.addf %251, %250 : vector<2x128xf32>
    %253 = arith.divf %251, %252 : vector<2x128xf32>
    %254 = math.tanh %248 : vector<2x128xf32>
    %255 = vector.extract_strided_slice %253 {offsets = [0, 0], sizes = [2, 32], strides = [1, 1]} : vector<2x128xf32> to vector<2x32xf32>
    %256 = vector.extract_strided_slice %253 {offsets = [0, 32], sizes = [2, 32], strides = [1, 1]} : vector<2x128xf32> to vector<2x32xf32>
    %257 = vector.extract_strided_slice %254 {offsets = [0, 64], sizes = [2, 32], strides = [1, 1]} : vector<2x128xf32> to vector<2x32xf32>
    %258 = vector.extract_strided_slice %253 {offsets = [0, 96], sizes = [2, 32], strides = [1, 1]} : vector<2x128xf32> to vector<2x32xf32>
    %259 = arith.mulf %256, %243 : vector<2x32xf32>
    %260 = arith.mulf %255, %257 : vector<2x32xf32>
    %261 = arith.addf %259, %260 : vector<2x32xf32>
    %262 = math.tanh %261 : vector<2x32xf32>
    %263 = arith.mulf %258, %262 : vector<2x32xf32>
    %264 = vector.extract_strided_slice %160 {offsets = [12, 0], sizes = [2, 128], strides = [1, 1]} : vector<16x128xf32> to vector<2x128xf32>
    %cst_51 = arith.constant dense<0.000000e+00> : vector<2x128xf32>
    %265 = tpu.matmul %263, %155, %cst_51 {dimension_numbers = #tpu.dot_dimension_numbers<[1], [0], [0], [1], [0, 0, 1, 1], [], []>} : vector<2x32xf32>, vector<32x128xf32>, vector<2x128xf32> -> vector<2x128xf32>
    %266 = arith.addf %264, %265 : vector<2x128xf32>
    %267 = arith.negf %266 : vector<2x128xf32>
    %268 = math.exp %267 : vector<2x128xf32>
    %cst_52 = arith.constant 1.000000e+00 : f32
    %269 = vector.broadcast %cst_52 : f32 to vector<2x128xf32>
    %270 = arith.addf %269, %268 : vector<2x128xf32>
    %271 = arith.divf %269, %270 : vector<2x128xf32>
    %272 = math.tanh %266 : vector<2x128xf32>
    %273 = vector.extract_strided_slice %271 {offsets = [0, 0], sizes = [2, 32], strides = [1, 1]} : vector<2x128xf32> to vector<2x32xf32>
    %274 = vector.extract_strided_slice %271 {offsets = [0, 32], sizes = [2, 32], strides = [1, 1]} : vector<2x128xf32> to vector<2x32xf32>
    %275 = vector.extract_strided_slice %272 {offsets = [0, 64], sizes = [2, 32], strides = [1, 1]} : vector<2x128xf32> to vector<2x32xf32>
    %276 = vector.extract_strided_slice %271 {offsets = [0, 96], sizes = [2, 32], strides = [1, 1]} : vector<2x128xf32> to vector<2x32xf32>
    %277 = arith.mulf %274, %261 : vector<2x32xf32>
    %278 = arith.mulf %273, %275 : vector<2x32xf32>
    %279 = arith.addf %277, %278 : vector<2x32xf32>
    %280 = math.tanh %279 : vector<2x32xf32>
    %281 = arith.mulf %276, %280 : vector<2x32xf32>
    %282 = vector.extract_strided_slice %160 {offsets = [14, 0], sizes = [2, 128], strides = [1, 1]} : vector<16x128xf32> to vector<2x128xf32>
    %cst_53 = arith.constant dense<0.000000e+00> : vector<2x128xf32>
    %283 = tpu.matmul %281, %155, %cst_53 {dimension_numbers = #tpu.dot_dimension_numbers<[1], [0], [0], [1], [0, 0, 1, 1], [], []>} : vector<2x32xf32>, vector<32x128xf32>, vector<2x128xf32> -> vector<2x128xf32>
    %284 = arith.addf %282, %283 : vector<2x128xf32>
    %285 = arith.negf %284 : vector<2x128xf32>
    %286 = math.exp %285 : vector<2x128xf32>
    %cst_54 = arith.constant 1.000000e+00 : f32
    %287 = vector.broadcast %cst_54 : f32 to vector<2x128xf32>
    %288 = arith.addf %287, %286 : vector<2x128xf32>
    %289 = arith.divf %287, %288 : vector<2x128xf32>
    %290 = math.tanh %284 : vector<2x128xf32>
    %291 = vector.extract_strided_slice %289 {offsets = [0, 0], sizes = [2, 32], strides = [1, 1]} : vector<2x128xf32> to vector<2x32xf32>
    %292 = vector.extract_strided_slice %289 {offsets = [0, 32], sizes = [2, 32], strides = [1, 1]} : vector<2x128xf32> to vector<2x32xf32>
    %293 = vector.extract_strided_slice %290 {offsets = [0, 64], sizes = [2, 32], strides = [1, 1]} : vector<2x128xf32> to vector<2x32xf32>
    %294 = vector.extract_strided_slice %289 {offsets = [0, 96], sizes = [2, 32], strides = [1, 1]} : vector<2x128xf32> to vector<2x32xf32>
    %295 = arith.mulf %292, %279 : vector<2x32xf32>
    %296 = arith.mulf %291, %293 : vector<2x32xf32>
    %297 = arith.addf %295, %296 : vector<2x32xf32>
    %298 = math.tanh %297 : vector<2x32xf32>
    %299 = arith.mulf %294, %298 : vector<2x32xf32>
    %c0_55 = arith.constant 0 : index
    %c0_56 = arith.constant 0 : index
    %300 = vector.load %arg7[%c0_55, %c0_56] : memref<32x4xf32, #tpu.memory_space<vmem>>, vector<32x4xf32>
    %cst_57 = arith.constant dense<0.000000e+00> : vector<2x4xf32>
    %301 = tpu.matmul %299, %300, %cst_57 {dimension_numbers = #tpu.dot_dimension_numbers<[1], [0], [0], [1], [0, 0, 1, 1], [], []>} : vector<2x32xf32>, vector<32x4xf32>, vector<2x4xf32> -> vector<2x4xf32>
    %c0_58 = arith.constant 0 : index
    %c0_59 = arith.constant 0 : index
    %302 = vector.load %arg8[%c0_58, %c0_59] : memref<1x4xf32, #tpu.memory_space<vmem>>, vector<1x4xf32>
    %303 = vector.broadcast %302 : vector<1x4xf32> to vector<2x4xf32>
    %304 = arith.addf %301, %303 : vector<2x4xf32>
    %c0_60 = arith.constant 0 : index
    %c0_61 = arith.constant 0 : index
    %305 = vector.load %arg9[%c0_60, %c0_61] : memref<2x4xf32, #tpu.memory_space<vmem>>, vector<2x4xf32>
    tpu.vector_store %arg9[%c0_60, %c0_61], %304 {strides = array<i32>} : memref<2x4xf32, #tpu.memory_space<vmem>>, vector<2x4xf32>,
    return
  }
}

</mosaic_0001>

<bundles_post_ra>
// kernel: lstm_emotion_forward.1
= control target key start
LH: loop header
LB: loop body
LE: loop exit
PB: predicated region body
PF: predicated region fallthrough
CT: control target
= control target key end

     0   :  { %vm50_vm0 = vcmask 261120   ;;  %s2849_s0 = inlined_call_operand.vmem [shape: f32[16,32], index: 0, kind: input, shape index: {}]   ;;  %s2850_s1 = inlined_call_operand.vmem [shape: f32[32,128], index: 1, kind: input, shape index: {}]   ;;  %s2851_s2 = inlined_call_operand.vmem [shape: f32[32,128], index: 2, kind: input, shape index: {}]   ;;  %s2852_s3 = inlined_call_operand.vmem [shape: f32[1,128], index: 3, kind: input, shape index: {}]   ;;  %s2853_s4 = inlined_call_operand.vmem [shape: f32[32,128], index: 4, kind: input, shape index: {}]   ;;  %s2854_s5 = inlined_call_operand.vmem [shape: f32[32,128], index: 5, kind: input, shape index: {}]   ;;  %s2855_s6 = inlined_call_operand.vmem [shape: f32[1,128], index: 6, kind: input, shape index: {}]   ;;  %s2856_s7 = inlined_call_operand.vmem [shape: f32[32,4], index: 7, kind: input, shape index: {}]   ;;  %s2857_s8 = inlined_call_operand.vmem [shape: f32[1,4], index: 8, kind: input, shape index: {}]   ;;  %s2858_s9 = inlined_call_operand.hbm [shape: f32[2,4], index: 9, kind: output, shape index: {}]  }
   0x1   :  { %v33_v0 = vld [vmem:[%s2850_s1] sm:$0xff]  ;;  %v34_v1 = vld [vmem:[%s2850_s1 + $0x8] sm:$0xff]  ;;  %v35_v2 = vld [vmem:[%s2850_s1 + $0x10] sm:$0xff] }
   0x2   :  { %v2206_v3 = vpack.c.bf16 %v34_v1, %v33_v0  ;;  %v36_v4 = vld [vmem:[%s2850_s1 + $0x18] sm:$0xff]  ;;  %v42_v5 = vld [vmem:[%s2849_s0] sm:$0xff] }
   0x3   :  { %v2210_v6 = vpack.c.bf16 %v36_v4, %v35_v2  ;;  %2027 = vmatprep.mubr.msk.f32.mxu0 %vm50_vm0, %v42_v5 }
   0x4   :  { %14 = vsyncpa [#allocation4], 0  ;;  %2207 = vmatprep.subr.bf16.mxu0 %v2206_v3  ;;  %v43_v7 = vld [vmem:[%s2849_s0 + $0x8] sm:$0xff]  ;;  %v1894_v8 = vld [vmem:[%s2852_s3] ss:$0 sm:$0xff]  ;;  %s2471_s22 = smov 64  }
   0x5   :  { %2209 = vmatpush3.bf16.msra.mxu0 %v2206_v3  ;;  %v37_v20 = vld [vmem:[%s2851_s2] sm:$0xff]  ;;  %v38_v21 = vld [vmem:[%s2851_s2 + $0x8] sm:$0xff]  ;;  %v39_v22 = vld [vmem:[%s2851_s2 + $0x10] sm:$0xff]  ;;  %v2472_v23 = vmov 0.0|0.0   ;;  %vm2473_vm1 = vmmov 0   ;;  %v2474_v26 = vmov 0.0  }
   0x6   :  { %2211 = vmatprep.subr.bf16.mxu0 %v2210_v6  ;;  %2214 = vmatprep.subr.bf16.mxu1 %v2472_v23  ;;  %v2568_v24 = vpack.c.bf16 %v38_v21, %v37_v20  ;;  %v40_v25 = vld [vmem:[%s2851_s2 + $0x18] sm:$0xff]  ;;  %s2475_s2 = smov 96   ;;  %s2476_s29 = smov 32   ;;  %vm154_vm2 = vcmask 254976   ;;  %vm265_vm3 = vcmask 257026   ;;  %vm489_vm4 = vcmask 261126  }
   0x7   :  { %2038 = vmatprep.mubr.msk.f32.mxu1 %vm2473_vm1, %v2474_v26  ;;  %v2579_v27 = vpack.c.bf16 %v40_v25, %v39_v22  ;;  %vm377_vm5 = vcmask 259076   ;;  %vm1878_vm6 = vcmask 25600  }
   0x8   :  { %2216 = vmatpush3.bf16.msra.mxu1 %v2568_v24 }
   0x9   :  { %2213 = vmatpush3.bf16.msra.mxu0 %v2210_v6  ;;  %2217 = vmatprep.subr.bf16.mxu1 %v2472_v23 }
   0xa   :  { %2220 = vmatprep.subr.bf16.mxu0 %v2472_v23 }
   0xc   :  { %2028 = vmatmul.mubr.msk.f32.vlgmr.msra.gmra.mrb[0].mxu0 %vm50_vm0, %v43_v7  ;;  %2219 = vmatpush3.bf16.msra.mxu1 %v2579_v27 }
   0xd   :  { %2049 = vmatprep.mubr.msk.f32.mxu0 %vm2473_vm1, %v2474_v26  ;;  %2222 = vmatpush3.bf16.msra.mxu0 %v2568_v24 }
   0xe   :  { %2223 = vmatprep.subr.bf16.mxu0 %v2472_v23  ;;  %2226 = vmatprep.subr.bf16.mxu1 %v2472_v23 }
  0x11   :  { %2225 = vmatpush3.bf16.msra.mxu0 %v2579_v27 }
  0x12   :  { %2232 = vmatprep.subr.bf16.mxu0 %v2472_v23 }
  0xdf   :  { %v2029_v9 = vpop.f32.mrb[0].mxu0 }
  0xe0   :  { %v2551_v10 = vadd.f32 %v2029_v9, %v1894_v8  ;;  %v123_v11 = vpop.f32.mrb[1].mxu0 }
  0xe1   :  { %v2553_v12 = vadd.f32 %v1894_v8, %v123_v11 }
  0xe3   :  { %2319 = vtanh.f32 %v2553_v12  ;;  %v1897_v14 = vmul.f32 -1.442695, %v2553_v12 }
  0xe5   :  { %2321 = vpow2.f32 %v1897_v14 }
  0xed   :  { %v2320_v13 = vpop.eup %2319 }
  0xee   :  { %140 = vrot.lane.b32.xlu0 %v2320_v13, %s2471_s22 }
  0xef   :  { %v2322_v15 = vpop.eup %2321 }
  0xf0   :  { %v135_v16 = vadd.f32 1.0, %v2322_v15 }
  0xf2   :  { %2323 = vrcp.f32 %v135_v16 }
  0xfc   :  { %v2324_v17 = vpop.eup %2323 }
 0x160   :  { %v141_v18 = vpop.permute.xlu0 %140 }
 0x161   :  { %v143_v19 = vmul.f32 %v2324_v17, %v141_v18 }
 0x163   :  { %2325 = vtanh.f32 %v143_v19  ;;  %v240_v29 = vrot.slane %v143_v19, 6 }
 0x16d   :  { %v2326_v28 = vpop.eup %2325 }
 0x16e   :  { %146 = vrot.lane.b32.xlu0 %v2326_v28, %s2475_s2 }
 0x172   :  { %241 = vrot.lane.b32.xlu0 %v240_v29, %s2476_s29 }
 0x1e0   :  { %v147_v30 = vpop.permute.xlu0 %146 }
 0x1e1   :  { %v149_v31 = vmul.f32 %v2324_v17, %v147_v30 }
 0x1e3   :  { %151 = vrot.lane.b32.xlu1 %v149_v31, %s2476_s29 }
 0x1e4   :  { %v242_v44 = vpop.permute.xlu0 %241 }
 0x255   :  { %v152_v32 = vpop.permute.xlu1 %151 }
 0x256   :  { %155 = vst.msk [vmem:[#allocation2] sm:$0x3] %vm154_vm2, %v152_v32  ;;  %2039 = vmatmul.mubr.msk.f32.vlgmr.msra.gmra.mrb[0].mxu1 %vm50_vm0, %v152_v32 }
 0x257   :  { %2228 = vmatpush3.bf16.msra.mxu1 %v2568_v24  ;;  %2060 = vmatprep.mubr.msk.f32.mxu1 %vm2473_vm1, %v2474_v26 }
 0x258   :  { %2229 = vmatprep.subr.bf16.mxu1 %v2472_v23 }
 0x25b   :  { %2231 = vmatpush3.bf16.msra.mxu1 %v2579_v27 }
 0x25c   :  { %2238 = vmatprep.subr.bf16.mxu1 %v2472_v23 }
 0x329   :  { %v224_v33 = vpop.f32.mrb[0].mxu1 }
 0x32a   :  { %v229_v34 = vrot.slane %v224_v33, 6  ;;  %v2040_v35 = vpop.f32.mrb[1].mxu1 }
 0x32c   :  { %v231_v36 = vadd.f32 %v229_v34, %v2553_v12 }
 0x32e   :  { %2327 = vtanh.f32 %v231_v36  ;;  %v1899_v38 = vmul.f32 -1.442695, %v231_v36 }
 0x330   :  { %2329 = vpow2.f32 %v1899_v38 }
 0x338   :  { %v2328_v37 = vpop.eup %2327 }
 0x339   :  { %246 = vrot.lane.b32.xlu1 %v2328_v37, %s2471_s22 }
 0x33a   :  { %v2330_v39 = vpop.eup %2329 }
 0x33b   :  { %v235_v40 = vadd.f32 1.0, %v2330_v39 }
 0x33d   :  { %2331 = vrcp.f32 %v235_v40 }
 0x347   :  { %v2332_v41 = vpop.eup %2331 }
 0x348   :  { %v244_v45 = vmul.f32 %v2332_v41, %v242_v44 }
 0x3ab   :  { %v247_v42 = vpop.permute.xlu1 %246 }
 0x3ac   :  { %v249_v43 = vmul.f32 %v2332_v41, %v247_v42 }
 0x3ae   :  { %251 = vrot.lane.b32.xlu1 %v249_v43, %s2476_s29 }
 0x420   :  { %v252_v46 = vpop.permute.xlu1 %251 }
 0x421   :  { %v254_v47 = vadd.f32 %v252_v46, %v244_v45 }
 0x423   :  { %2333 = vtanh.f32 %v254_v47  ;;  %v354_v0 = vrot.slane %v254_v47, 6 }
 0x42d   :  { %v2334_v48 = vpop.eup %2333 }
 0x42e   :  { %257 = vrot.lane.b32.xlu0 %v2334_v48, %s2471_s22 }
 0x4a0   :  { %v258_v49 = vpop.permute.xlu0 %257 }
 0x4a1   :  { %v2603_v50 = vmul.f32 %v2332_v41, %v258_v49 }
 0x4a3   :  { %v267_v51 = vrot.slane %v2603_v50, 2 }
 0x4a5   :  { %268 = vrot.lane.b32.xlu1 %v267_v51, %s2476_s29 }
 0x517   :  { %v269_v52 = vpop.permute.xlu1 %268 }
 0x518   :  { %2050 = vmatmul.mubr.msk.f32.vlgmr.msra.gmra.mrb[2].mxu0 %vm50_vm0, %v269_v52 }
 0x519   :  { %2234 = vmatpush3.bf16.msra.mxu0 %v2568_v24  ;;  %2071 = vmatprep.mubr.msk.f32.mxu0 %vm2473_vm1, %v2474_v26 }
 0x51a   :  { %2235 = vmatprep.subr.bf16.mxu0 %v2472_v23 }
 0x51d   :  { %2237 = vmatpush3.bf16.msra.mxu0 %v2579_v27 }
 0x51e   :  { %2244 = vmatprep.subr.bf16.mxu0 %v2472_v23 }
 0x5eb   :  { %v338_v53 = vpop.f32.mrb[2].mxu0 }
 0x5ec   :  { %v343_v54 = vrot.slane %v338_v53, 4  ;;  %v2051_v55 = vpop.f32.mrb[3].mxu0 }
 0x5ee   :  { %v345_v56 = vadd.f32 %v343_v54, %v2553_v12 }
 0x5f0   :  { %2335 = vtanh.f32 %v345_v56  ;;  %v1901_v58 = vmul.f32 -1.442695, %v345_v56 }
 0x5f2   :  { %2337 = vpow2.f32 %v1901_v58 }
 0x5fa   :  { %v2336_v57 = vpop.eup %2335 }
 0x5fb   :  { %358 = vrot.lane.b32.xlu0 %v2336_v57, %s2471_s22 }
 0x5fc   :  { %v2338_v59 = vpop.eup %2337 }
 0x5fd   :  { %v349_v60 = vadd.f32 1.0, %v2338_v59 }
 0x5ff   :  { %2339 = vrcp.f32 %v349_v60 }
 0x609   :  { %v2340_v61 = vpop.eup %2339 }
 0x60a   :  { %v356_v1 = vmul.f32 %v2340_v61, %v354_v0 }
 0x66d   :  { %v359_v62 = vpop.permute.xlu0 %358 }
 0x66e   :  { %v361_v63 = vmul.f32 %v2340_v61, %v359_v62 }
 0x670   :  { %363 = vrot.lane.b32.xlu1 %v361_v63, %s2476_s29 }
 0x6e2   :  { %v364_v2 = vpop.permute.xlu1 %363 }
 0x6e3   :  { %v366_v3 = vadd.f32 %v364_v2, %v356_v1 }
 0x6e5   :  { %2341 = vtanh.f32 %v366_v3  ;;  %v466_v22 = vrot.slane %v366_v3, 6 }
 0x6ef   :  { %v2342_v4 = vpop.eup %2341 }
 0x6f0   :  { %369 = vrot.lane.b32.xlu0 %v2342_v4, %s2471_s22 }
 0x762   :  { %v370_v5 = vpop.permute.xlu0 %369 }
 0x763   :  { %v2618_v6 = vmul.f32 %v2340_v61, %v370_v5 }
 0x765   :  { %v379_v7 = vrot.slane %v2618_v6, 4 }
 0x767   :  { %380 = vrot.lane.b32.xlu1 %v379_v7, %s2476_s29 }
 0x7d9   :  { %v381_v8 = vpop.permute.xlu1 %380 }
 0x7da   :  { %2061 = vmatmul.mubr.msk.f32.vlgmr.msra.gmra.mrb[2].mxu1 %vm50_vm0, %v381_v8 }
 0x7db   :  { %2240 = vmatpush3.bf16.msra.mxu1 %v2568_v24  ;;  %2082 = vmatprep.mubr.msk.f32.mxu1 %vm2473_vm1, %v2474_v26 }
 0x7dc   :  { %2241 = vmatprep.subr.bf16.mxu1 %v2472_v23 }
 0x7df   :  { %2243 = vmatpush3.bf16.msra.mxu1 %v2579_v27 }
 0x7e0   :  { %2250 = vmatprep.subr.bf16.mxu1 %v2472_v23 }
 0x8ad   :  { %v450_v9 = vpop.f32.mrb[2].mxu1 }
 0x8ae   :  { %v455_v11 = vrot.slane %v450_v9, 2  ;;  %v2062_v13 = vpop.f32.mrb[3].mxu1 }
 0x8b0   :  { %v457_v14 = vadd.f32 %v455_v11, %v2553_v12 }
 0x8b2   :  { %2343 = vtanh.f32 %v457_v14  ;;  %v1903_v16 = vmul.f32 -1.442695, %v457_v14 }
 0x8b4   :  { %2345 = vpow2.f32 %v1903_v16 }
 0x8bc   :  { %v2344_v15 = vpop.eup %2343 }
 0x8bd   :  { %470 = vrot.lane.b32.xlu0 %v2344_v15, %s2471_s22 }
 0x8be   :  { %v2346_v17 = vpop.eup %2345 }
 0x8bf   :  { %v461_v18 = vadd.f32 1.0, %v2346_v17 }
 0x8c1   :  { %2347 = vrcp.f32 %v461_v18 }
 0x8cb   :  { %v2348_v19 = vpop.eup %2347 }
 0x8cc   :  { %v468_v25 = vmul.f32 %v2348_v19, %v466_v22 }
 0x92f   :  { %v471_v20 = vpop.permute.xlu0 %470 }
 0x930   :  { %v473_v21 = vmul.f32 %v2348_v19, %v471_v20 }
 0x932   :  { %475 = vrot.lane.b32.xlu1 %v473_v21, %s2476_s29 }
 0x9a4   :  { %v476_v28 = vpop.permute.xlu1 %475 }
 0x9a5   :  { %v478_v29 = vadd.f32 %v476_v28, %v468_v25 }
 0x9a7   :  { %2349 = vtanh.f32 %v478_v29  ;;  %v575_v44 = vrot.slane %v478_v29, 6 }
 0x9b1   :  { %v2350_v12 = vpop.eup %2349 }
 0x9b2   :  { %481 = vrot.lane.b32.xlu0 %v2350_v12, %s2471_s22 }
 0xa24   :  { %v482_v30 = vpop.permute.xlu0 %481 }
 0xa25   :  { %v2633_v31 = vmul.f32 %v2348_v19, %v482_v30 }
 0xa27   :  { %v491_v32 = vrot.slane %v2633_v31, 6 }
 0xa29   :  { %492 = vrot.lane.b32.xlu1 %v491_v32, %s2476_s29 }
 0xa9b   :  { %v493_v33 = vpop.permute.xlu1 %492 }
 0xa9c   :  { %2072 = vmatmul.mubr.msk.f32.vlgmr.msra.gmra.mrb[4].mxu0 %vm50_vm0, %v493_v33 }
 0xa9d   :  { %2246 = vmatpush3.bf16.msra.mxu0 %v2568_v24  ;;  %2093 = vmatprep.mubr.msk.f32.mxu0 %vm2473_vm1, %v2474_v26 }
 0xa9e   :  { %2247 = vmatprep.subr.bf16.mxu0 %v2472_v23 }
 0xaa1   :  { %2249 = vmatpush3.bf16.msra.mxu0 %v2579_v27 }
 0xb6f   :  { %v562_v34 = vpop.f32.mrb[4].mxu0 }
 0xb70   :  { %v566_v35 = vadd.f32 %v562_v34, %v2551_v10  ;;  %v2073_v36 = vpop.f32.mrb[5].mxu0 }
 0xb72   :  { %2351 = vtanh.f32 %v566_v35  ;;  %v1905_v38 = vmul.f32 -1.442695, %v566_v35 }
 0xb74   :  { %2353 = vpow2.f32 %v1905_v38 }
 0xb7c   :  { %v2352_v37 = vpop.eup %2351 }
 0xb7d   :  { %579 = vrot.lane.b32.xlu0 %v2352_v37, %s2471_s22 }
 0xb7e   :  { %v2354_v39 = vpop.eup %2353 }
 0xb7f   :  { %v570_v40 = vadd.f32 1.0, %v2354_v39 }
 0xb81   :  { %2355 = vrcp.f32 %v570_v40 }
 0xb8b   :  { %v2356_v41 = vpop.eup %2355 }
 0xb8c   :  { %v577_v45 = vmul.f32 %v2356_v41, %v575_v44 }
 0xbef   :  { %v580_v42 = vpop.permute.xlu0 %579 }
 0xbf0   :  { %v582_v43 = vmul.f32 %v2356_v41, %v580_v42 }
 0xbf2   :  { %584 = vrot.lane.b32.xlu1 %v582_v43, %s2476_s29 }
 0xc64   :  { %v585_v46 = vpop.permute.xlu1 %584 }
 0xc65   :  { %v587_v47 = vadd.f32 %v585_v46, %v577_v45 }
 0xc67   :  { %2357 = vtanh.f32 %v587_v47 }
 0xc71   :  { %v2358_v48 = vpop.eup %2357 }
 0xc72   :  { %590 = vrot.lane.b32.xlu0 %v2358_v48, %s2471_s22 }
 0xce4   :  { %v591_v49 = vpop.permute.xlu0 %590 }
 0xce5   :  { %v593_v51 = vmul.f32 %v2356_v41, %v591_v49 }
 0xce7   :  { %595 = vrot.lane.b32.xlu1 %v593_v51, %s2476_s29 }
 0xd59   :  { %v596_v52 = vpop.permute.xlu1 %595 }
 0xd5a   :  { %598 = vst.msk [vmem:[#allocation2 + $0x8] sm:$0x3] %vm154_vm2, %v596_v52  ;;  %2083 = vmatmul.mubr.msk.f32.vlgmr.msra.gmra.mrb[4].mxu1 %vm50_vm0, %v596_v52  ;;  %v930_v52 = vld [vmem:[%s2853_s4 + $0x8] sm:$0xff] }
 0xd5b   :  { %2252 = vmatpush3.bf16.msra.mxu1 %v2568_v24  ;;  %2104 = vmatprep.mubr.msk.f32.mxu1 %vm2473_vm1, %v2474_v26 }
 0xd5c   :  { %2253 = vmatprep.subr.bf16.mxu1 %v2472_v23 }
 0xd5f   :  { %2255 = vmatpush3.bf16.msra.mxu1 %v2579_v27  ;;  %v683_v27 = vrot.slane %v587_v47, 6 }
 0xd60   :  { %2264 = vmatprep.subr.bf16.mxu1 %v2472_v23 }
 0xe2d   :  { %v667_v53 = vpop.f32.mrb[4].mxu1 }
 0xe2e   :  { %v672_v54 = vrot.slane %v667_v53, 6  ;;  %v2084_v55 = vpop.f32.mrb[5].mxu1 }
 0xe30   :  { %v674_v56 = vadd.f32 %v672_v54, %v2551_v10  ;;  %v931_v54 = vld [vmem:[%s2853_s4 + $0x10] sm:$0xff] }
 0xe32   :  { %2359 = vtanh.f32 %v674_v56  ;;  %v1907_v58 = vmul.f32 -1.442695, %v674_v56 }
 0xe34   :  { %2361 = vpow2.f32 %v1907_v58 }
 0xe3c   :  { %v2360_v57 = vpop.eup %2359 }
 0xe3d   :  { %687 = vrot.lane.b32.xlu0 %v2360_v57, %s2471_s22 }
 0xe3e   :  { %v2362_v24 = vpop.eup %2361 }
 0xe3f   :  { %v678_v59 = vadd.f32 1.0, %v2362_v24 }
 0xe41   :  { %2363 = vrcp.f32 %v678_v59 }
 0xe4b   :  { %v2364_v60 = vpop.eup %2363 }
 0xe4c   :  { %v685_v63 = vmul.f32 %v2364_v60, %v683_v27 }
 0xeaf   :  { %v688_v61 = vpop.permute.xlu0 %687 }
 0xeb0   :  { %v690_v62 = vmul.f32 %v2364_v60, %v688_v61 }
 0xeb2   :  { %692 = vrot.lane.b32.xlu1 %v690_v62, %s2476_s29  ;;  %v1912_v62 = vld [vmem:[%s2855_s6] ss:$0 sm:$0xff] }
 0xf24   :  { %v693_v0 = vpop.permute.xlu1 %692 }
 0xf25   :  { %v695_v1 = vadd.f32 %v693_v0, %v685_v63 }
 0xf27   :  { %2365 = vtanh.f32 %v695_v1  ;;  %v794_v21 = vrot.slane %v695_v1, 6 }
 0xf31   :  { %v2366_v2 = vpop.eup %2365 }
 0xf32   :  { %698 = vrot.lane.b32.xlu0 %v2366_v2, %s2471_s22 }
 0xfa4   :  { %v699_v3 = vpop.permute.xlu0 %698 }
 0xfa5   :  { %v2660_v4 = vmul.f32 %v2364_v60, %v699_v3 }
 0xfa7   :  { %v707_v5 = vrot.slane %v2660_v4, 2 }
 0xfa9   :  { %708 = vrot.lane.b32.xlu1 %v707_v5, %s2476_s29 }
0x101b   :  { %v709_v7 = vpop.permute.xlu1 %708 }
0x101c   :  { %2094 = vmatmul.mubr.msk.f32.vlgmr.msra.gmra.mrb[6].mxu0 %vm50_vm0, %v709_v7 }
0x10ef   :  { %v778_v8 = vpop.f32.mrb[6].mxu0 }
0x10f0   :  { %v783_v9 = vrot.slane %v778_v8, 4  ;;  %v2095_v11 = vpop.f32.mrb[7].mxu0 }
0x10f1   :  { %v933_v11 = vld [vmem:[%s2854_s5] sm:$0xff] }
0x10f2   :  { %v785_v13 = vadd.f32 %v783_v9, %v2551_v10 }
0x10f4   :  { %2367 = vtanh.f32 %v785_v13  ;;  %v1909_v15 = vmul.f32 -1.442695, %v785_v13  ;;  %v934_v13 = vld [vmem:[%s2854_s5 + $0x8] sm:$0xff] }
0x10f6   :  { %2369 = vpow2.f32 %v1909_v15  ;;  %v2729_v15 = vpack.c.bf16 %v934_v13, %v933_v11 }
0x10fe   :  { %v2368_v14 = vpop.eup %2367 }
0x10ff   :  { %798 = vrot.lane.b32.xlu0 %v2368_v14, %s2471_s22  ;;  %v935_v14 = vld [vmem:[%s2854_s5 + $0x10] sm:$0xff] }
0x1100   :  { %v2370_v16 = vpop.eup %2369 }
0x1101   :  { %v789_v17 = vadd.f32 1.0, %v2370_v16  ;;  %v936_v16 = vld [vmem:[%s2854_s5 + $0x18] sm:$0xff] }
0x1103   :  { %2371 = vrcp.f32 %v789_v17  ;;  %v2735_v17 = vpack.c.bf16 %v936_v16, %v935_v14 }
0x110d   :  { %v2372_v18 = vpop.eup %2371 }
0x110e   :  { %v796_v22 = vmul.f32 %v2372_v18, %v794_v21 }
0x1171   :  { %v799_v19 = vpop.permute.xlu0 %798 }
0x1172   :  { %v801_v20 = vmul.f32 %v2372_v18, %v799_v19 }
0x1174   :  { %803 = vrot.lane.b32.xlu1 %v801_v20, %s2476_s29 }
0x11e6   :  { %v804_v25 = vpop.permute.xlu1 %803 }
0x11e7   :  { %v806_v28 = vadd.f32 %v804_v25, %v796_v22 }
0x11e9   :  { %2373 = vtanh.f32 %v806_v28 }
0x11f3   :  { %v2374_v29 = vpop.eup %2373 }
0x11f4   :  { %809 = vrot.lane.b32.xlu0 %v2374_v29, %s2471_s22 }
0x1266   :  { %v810_v12 = vpop.permute.xlu0 %809 }
0x1267   :  { %v812_v30 = vmul.f32 %v2372_v18, %v810_v12 }
0x1269   :  { %v818_v32 = vrot.slane %v812_v30, 4 }
0x126b   :  { %819 = vrot.lane.b32.xlu1 %v818_v32, %s2476_s29 }
0x12dd   :  { %v820_v33 = vpop.permute.xlu1 %819 }
0x12de   :  { %2105 = vmatmul.mubr.msk.f32.vlgmr.msra.gmra.mrb[6].mxu1 %vm50_vm0, %v820_v33 }
0x12df   :  { %2126 = vmatprep.mubr.msk.f32.mxu1 %vm2473_vm1, %v2474_v26  ;;  %2266 = vmatpush3.bf16.msra.mxu1 %v2729_v15 }
0x12e0   :  { %2267 = vmatprep.subr.bf16.mxu1 %v2472_v23 }
0x12e3   :  { %2269 = vmatpush3.bf16.msra.mxu1 %v2735_v17 }
0x12e4   :  { %2276 = vmatprep.subr.bf16.mxu1 %v2472_v23 }
0x13b1   :  { %v889_v34 = vpop.f32.mrb[6].mxu1 }
0x13b2   :  { %v894_v35 = vrot.slane %v889_v34, 2  ;;  %v2106_v36 = vpop.f32.mrb[7].mxu1 }
0x13b4   :  { %v896_v37 = vadd.f32 %v894_v35, %v2551_v10  ;;  %v905_v10 = vrot.slane %v806_v28, 6 }
0x13b6   :  { %2375 = vtanh.f32 %v896_v37  ;;  %v1911_v39 = vmul.f32 -1.442695, %v896_v37 }
0x13b8   :  { %2377 = vpow2.f32 %v1911_v39 }
0x13c0   :  { %v2376_v38 = vpop.eup %2375 }
0x13c1   :  { %909 = vrot.lane.b32.xlu0 %v2376_v38, %s2471_s22 }
0x13c2   :  { %v2378_v40 = vpop.eup %2377 }
0x13c3   :  { %v900_v41 = vadd.f32 1.0, %v2378_v40 }
0x13c5   :  { %2379 = vrcp.f32 %v900_v41 }
0x13cf   :  { %v2380_v42 = vpop.eup %2379 }
0x13d0   :  { %v907_v45 = vmul.f32 %v2380_v42, %v905_v10 }
0x1433   :  { %v910_v43 = vpop.permute.xlu0 %909 }
0x1434   :  { %v912_v44 = vmul.f32 %v2380_v42, %v910_v43 }
0x1436   :  { %914 = vrot.lane.b32.xlu1 %v912_v44, %s2476_s29 }
0x143a   :  { %262 = vrot.lane.b32.xlu1 %v2603_v50, %s2476_s29 }
0x143e   :  { %486 = vrot.lane.b32.xlu1 %v2633_v31, %s2476_s29  ;;  %v929_v31 = vld [vmem:[%s2853_s4] sm:$0xff] }
0x143f   :  { %v2256_v53 = vpack.c.bf16 %v930_v52, %v929_v31 }
0x1441   :  { %2257 = vmatprep.subr.bf16.mxu0 %v2256_v53 }
0x1442   :  { %814 = vrot.lane.b32.xlu1 %v812_v30, %s2476_s29  ;;  %2259 = vmatpush3.bf16.msra.mxu0 %v2256_v53 }
0x14a8   :  { %v915_v46 = vpop.permute.xlu1 %914 }
0x14a9   :  { %v917_v47 = vadd.f32 %v915_v46, %v907_v45 }
0x14ab   :  { %2381 = vtanh.f32 %v917_v47 }
0x14ac   :  { %v263_v48 = vpop.permute.xlu1 %262 }
0x14ad   :  { %266 = vst.msk [vmem:[#allocation2] sm:$0xc] %vm265_vm3, %v263_v48 }
0x14b0   :  { %v487_v49 = vpop.permute.xlu1 %486 }
0x14b1   :  { %490 = vst.msk [vmem:[#allocation2] sm:$0xc0] %vm489_vm4, %v487_v49 }
0x14b4   :  { %v815_v50 = vpop.permute.xlu1 %814 }
0x14b5   :  { %v2382_v51 = vpop.eup %2381  ;;  %817 = vst.msk [vmem:[#allocation2 + $0x8] sm:$0x30] %vm377_vm5, %v815_v50 }
0x14b6   :  { %920 = vrot.lane.b32.xlu0 %v2382_v51, %s2471_s22 }
0x14ba   :  { %374 = vrot.lane.b32.xlu0 %v2618_v6, %s2476_s29  ;;  %v932_v6 = vld [vmem:[%s2853_s4 + $0x18] sm:$0xff] }
0x14bb   :  { %v2260_v55 = vpack.c.bf16 %v932_v6, %v931_v54 }
0x14bd   :  { %2261 = vmatprep.subr.bf16.mxu0 %v2260_v55 }
0x14be   :  { %703 = vrot.lane.b32.xlu0 %v2660_v4, %s2476_s29  ;;  %2263 = vmatpush3.bf16.msra.mxu0 %v2260_v55 }
0x14bf   :  { %2270 = vmatprep.subr.bf16.mxu0 %v2472_v23 }
0x1528   :  { %v921_v56 = vpop.permute.xlu0 %920 }
0x1529   :  { %v923_v57 = vmul.f32 %v2380_v42, %v921_v56 }
0x152b   :  { %925 = vrot.lane.b32.xlu0 %v923_v57, %s2476_s29 }
0x152c   :  { %v375_v58 = vpop.permute.xlu0 %374 }
0x152d   :  { %378 = vst.msk [vmem:[#allocation2] sm:$0x30] %vm377_vm5, %v375_v58 }
0x1530   :  { %v704_v24 = vpop.permute.xlu0 %703 }
0x1531   :  { %706 = vst.msk [vmem:[#allocation2 + $0x8] sm:$0xc] %vm265_vm3, %v704_v24 }
0x1534   :  { %v938_v59 = vld [vmem:[#allocation2] sm:$0xff] }
0x1535   :  { %2115 = vmatprep.mubr.msk.f32.mxu0 %vm50_vm0, %v938_v59 }
0x159d   :  { %v926_v60 = vpop.permute.xlu0 %925 }
0x159e   :  { %928 = vst.msk [vmem:[#allocation2 + $0x8] sm:$0xc0] %vm489_vm4, %v926_v60 }
0x15a5   :  { %v939_v61 = vld [vmem:[#allocation2 + $0x8] sm:$0xff] }
0x15a6   :  { %2116 = vmatmul.mubr.msk.f32.vlgmr.msra.gmra.mrb[8].mxu0 %vm50_vm0, %v939_v61 }
0x15a7   :  { %2137 = vmatprep.mubr.msk.f32.mxu0 %vm2473_vm1, %v2474_v26  ;;  %2272 = vmatpush3.bf16.msra.mxu0 %v2729_v15 }
0x15a8   :  { %2273 = vmatprep.subr.bf16.mxu0 %v2472_v23 }
0x15ab   :  { %2275 = vmatpush3.bf16.msra.mxu0 %v2735_v17 }
0x15ac   :  { %2282 = vmatprep.subr.bf16.mxu0 %v2472_v23 }
0x1679   :  { %v2117_v27 = vpop.f32.mrb[8].mxu0 }
0x167a   :  { %v2713_v63 = vadd.f32 %v2117_v27, %v1912_v62  ;;  %v1018_v0 = vpop.f32.mrb[9].mxu0 }
0x167b   :  { %v2715_v1 = vadd.f32 %v1912_v62, %v1018_v0 }
0x167d   :  { %2383 = vtanh.f32 %v2715_v1  ;;  %v1915_v3 = vmul.f32 -1.442695, %v2715_v1 }
0x167f   :  { %2385 = vpow2.f32 %v1915_v3 }
0x1687   :  { %v2384_v2 = vpop.eup %2383 }
0x1688   :  { %1035 = vrot.lane.b32.xlu1 %v2384_v2, %s2471_s22 }
0x1689   :  { %v2386_v4 = vpop.eup %2385 }
0x168a   :  { %v1030_v5 = vadd.f32 1.0, %v2386_v4 }
0x168c   :  { %2387 = vrcp.f32 %v1030_v5 }
0x1696   :  { %v2388_v7 = vpop.eup %2387 }
0x16fa   :  { %v1036_v8 = vpop.permute.xlu1 %1035 }
0x16fb   :  { %v1038_v9 = vmul.f32 %v2388_v7, %v1036_v8 }
0x16fd   :  { %2389 = vtanh.f32 %v1038_v9  ;;  %v1132_v21 = vrot.slane %v1038_v9, 6 }
0x1707   :  { %v2390_v18 = vpop.eup %2389 }
0x1708   :  { %1041 = vrot.lane.b32.xlu0 %v2390_v18, %s2475_s2 }
0x177a   :  { %v1042_v19 = vpop.permute.xlu0 %1041 }
0x177b   :  { %v1044_v20 = vmul.f32 %v2388_v7, %v1042_v19 }
0x177d   :  { %1046 = vrot.lane.b32.xlu1 %v1044_v20, %s2476_s29 }
0x1781   :  { %1133 = vrot.lane.b32.xlu1 %v1132_v21, %s2476_s29 }
0x17ef   :  { %v1047_v22 = vpop.permute.xlu1 %1046 }
0x17f0   :  { %2127 = vmatmul.mubr.msk.f32.vlgmr.msra.gmra.mrb[8].mxu1 %vm50_vm0, %v1047_v22 }
0x17f1   :  { %2278 = vmatpush3.bf16.msra.mxu1 %v2729_v15  ;;  %2148 = vmatprep.mubr.msk.f32.mxu1 %vm2473_vm1, %v2474_v26 }
0x17f2   :  { %2279 = vmatprep.subr.bf16.mxu1 %v2472_v23 }
0x17f3   :  { %v1134_v38 = vpop.permute.xlu1 %1133 }
0x17f5   :  { %2281 = vmatpush3.bf16.msra.mxu1 %v2735_v17 }
0x17f6   :  { %2288 = vmatprep.subr.bf16.mxu1 %v2472_v23 }
0x18c3   :  { %v1116_v25 = vpop.f32.mrb[8].mxu1 }
0x18c4   :  { %v1121_v28 = vrot.slane %v1116_v25, 6  ;;  %v2128_v29 = vpop.f32.mrb[9].mxu1 }
0x18c6   :  { %v1123_v12 = vadd.f32 %v1121_v28, %v2715_v1 }
0x18c8   :  { %2391 = vtanh.f32 %v1123_v12  ;;  %v1917_v32 = vmul.f32 -1.442695, %v1123_v12 }
0x18ca   :  { %2393 = vpow2.f32 %v1917_v32 }
0x18d2   :  { %v2392_v30 = vpop.eup %2391 }
0x18d3   :  { %1138 = vrot.lane.b32.xlu0 %v2392_v30, %s2471_s22 }
0x18d4   :  { %v2394_v33 = vpop.eup %2393 }
0x18d5   :  { %v1127_v34 = vadd.f32 1.0, %v2394_v33 }
0x18d7   :  { %2395 = vrcp.f32 %v1127_v34 }
0x18e1   :  { %v2396_v35 = vpop.eup %2395 }
0x18e2   :  { %v1136_v39 = vmul.f32 %v2396_v35, %v1134_v38 }
0x1945   :  { %v1139_v36 = vpop.permute.xlu0 %1138 }
0x1946   :  { %v1141_v37 = vmul.f32 %v2396_v35, %v1139_v36 }
0x1948   :  { %1143 = vrot.lane.b32.xlu0 %v1141_v37, %s2476_s29 }
0x19ba   :  { %v1144_v40 = vpop.permute.xlu0 %1143 }
0x19bb   :  { %v1146_v41 = vadd.f32 %v1144_v40, %v1136_v39 }
0x19bd   :  { %2397 = vtanh.f32 %v1146_v41  ;;  %v1241_v55 = vrot.slane %v1146_v41, 6 }
0x19c7   :  { %v2398_v42 = vpop.eup %2397 }
0x19c8   :  { %1149 = vrot.lane.b32.xlu1 %v2398_v42, %s2471_s22 }
0x1a3a   :  { %v1150_v43 = vpop.permute.xlu1 %1149 }
0x1a3b   :  { %v1152_v44 = vmul.f32 %v2396_v35, %v1150_v43 }
0x1a3d   :  { %v1154_v10 = vrot.slane %v1152_v44, 2 }
0x1a3f   :  { %1155 = vrot.lane.b32.xlu0 %v1154_v10, %s2476_s29 }
0x1ab1   :  { %v1156_v45 = vpop.permute.xlu0 %1155 }
0x1ab2   :  { %2138 = vmatmul.mubr.msk.f32.vlgmr.msra.gmra.mrb[10].mxu0 %vm50_vm0, %v1156_v45 }
0x1ab3   :  { %2284 = vmatpush3.bf16.msra.mxu0 %v2729_v15  ;;  %2159 = vmatprep.mubr.msk.f32.mxu0 %vm2473_vm1, %v2474_v26 }
0x1ab4   :  { %2285 = vmatprep.subr.bf16.mxu0 %v2472_v23 }
0x1ab7   :  { %2287 = vmatpush3.bf16.msra.mxu0 %v2735_v17 }
0x1ab8   :  { %2294 = vmatprep.subr.bf16.mxu0 %v2472_v23 }
0x1b85   :  { %v1225_v46 = vpop.f32.mrb[10].mxu0 }
0x1b86   :  { %v1230_v47 = vrot.slane %v1225_v46, 4  ;;  %v2139_v48 = vpop.f32.mrb[11].mxu0 }
0x1b88   :  { %v1232_v49 = vadd.f32 %v1230_v47, %v2715_v1 }
0x1b8a   :  { %2399 = vtanh.f32 %v1232_v49  ;;  %v1919_v51 = vmul.f32 -1.442695, %v1232_v49 }
0x1b8c   :  { %2401 = vpow2.f32 %v1919_v51 }
0x1b94   :  { %v2400_v50 = vpop.eup %2399 }
0x1b95   :  { %1245 = vrot.lane.b32.xlu1 %v2400_v50, %s2471_s22 }
0x1b96   :  { %v2402_v31 = vpop.eup %2401 }
0x1b97   :  { %v1236_v52 = vadd.f32 1.0, %v2402_v31 }
0x1b99   :  { %2403 = vrcp.f32 %v1236_v52 }
0x1ba3   :  { %v2404_v53 = vpop.eup %2403 }
0x1ba4   :  { %v1243_v56 = vmul.f32 %v2404_v53, %v1241_v55 }
0x1c07   :  { %v1246_v54 = vpop.permute.xlu1 %1245 }
0x1c08   :  { %v1248_v6 = vmul.f32 %v2404_v53, %v1246_v54 }
0x1c0a   :  { %1250 = vrot.lane.b32.xlu0 %v1248_v6, %s2476_s29 }
0x1c7c   :  { %v1251_v57 = vpop.permute.xlu0 %1250 }
0x1c7d   :  { %v1253_v58 = vadd.f32 %v1251_v57, %v1243_v56 }
0x1c7f   :  { %2405 = vtanh.f32 %v1253_v58  ;;  %v1348_v14 = vrot.slane %v1253_v58, 6 }
0x1c89   :  { %v2406_v24 = vpop.eup %2405 }
0x1c8a   :  { %1256 = vrot.lane.b32.xlu1 %v2406_v24, %s2471_s22 }
0x1cfc   :  { %v1257_v59 = vpop.permute.xlu1 %1256 }
0x1cfd   :  { %v1259_v60 = vmul.f32 %v2404_v53, %v1257_v59 }
0x1cff   :  { %v1261_v61 = vrot.slane %v1259_v60, 4 }
0x1d01   :  { %1262 = vrot.lane.b32.xlu0 %v1261_v61, %s2476_s29 }
0x1d73   :  { %v1263_v62 = vpop.permute.xlu0 %1262 }
0x1d74   :  { %2149 = vmatmul.mubr.msk.f32.vlgmr.msra.gmra.mrb[10].mxu1 %vm50_vm0, %v1263_v62 }
0x1d75   :  { %2290 = vmatpush3.bf16.msra.mxu1 %v2729_v15  ;;  %2170 = vmatprep.mubr.msk.f32.mxu1 %vm2473_vm1, %v2474_v26 }
0x1d76   :  { %2291 = vmatprep.subr.bf16.mxu1 %v2472_v23 }
0x1d79   :  { %2293 = vmatpush3.bf16.msra.mxu1 %v2735_v17 }
0x1d7a   :  { %2300 = vmatprep.subr.bf16.mxu1 %v2472_v23 }
0x1e47   :  { %v1332_v27 = vpop.f32.mrb[10].mxu1 }
0x1e48   :  { %v1337_v0 = vrot.slane %v1332_v27, 2  ;;  %v2150_v2 = vpop.f32.mrb[11].mxu1 }
0x1e4a   :  { %v1339_v3 = vadd.f32 %v1337_v0, %v2715_v1 }
0x1e4c   :  { %2407 = vtanh.f32 %v1339_v3  ;;  %v1921_v5 = vmul.f32 -1.442695, %v1339_v3 }
0x1e4e   :  { %2409 = vpow2.f32 %v1921_v5 }
0x1e56   :  { %v2408_v4 = vpop.eup %2407 }
0x1e57   :  { %1352 = vrot.lane.b32.xlu1 %v2408_v4, %s2471_s22 }
0x1e58   :  { %v2410_v7 = vpop.eup %2409 }
0x1e59   :  { %v1343_v8 = vadd.f32 1.0, %v2410_v7 }
0x1e5b   :  { %2411 = vrcp.f32 %v1343_v8 }
0x1e65   :  { %v2412_v9 = vpop.eup %2411 }
0x1e66   :  { %v1350_v16 = vmul.f32 %v2412_v9, %v1348_v14 }
0x1ec9   :  { %v1353_v11 = vpop.permute.xlu1 %1352 }
0x1eca   :  { %v1355_v13 = vmul.f32 %v2412_v9, %v1353_v11 }
0x1ecc   :  { %1357 = vrot.lane.b32.xlu0 %v1355_v13, %s2476_s29 }
0x1f3e   :  { %v1358_v18 = vpop.permute.xlu0 %1357 }
0x1f3f   :  { %v1360_v19 = vadd.f32 %v1358_v18, %v1350_v16 }
0x1f41   :  { %2413 = vtanh.f32 %v1360_v19  ;;  %v1452_v38 = vrot.slane %v1360_v19, 6 }
0x1f4b   :  { %v2414_v1 = vpop.eup %2413 }
0x1f4c   :  { %1363 = vrot.lane.b32.xlu1 %v2414_v1, %s2471_s22 }
0x1fbe   :  { %v1364_v20 = vpop.permute.xlu1 %1363 }
0x1fbf   :  { %v1366_v21 = vmul.f32 %v2412_v9, %v1364_v20 }
0x1fc1   :  { %v1368_v22 = vrot.slane %v1366_v21, 6 }
0x1fc3   :  { %1369 = vrot.lane.b32.xlu0 %v1368_v22, %s2476_s29 }
0x2035   :  { %v1370_v25 = vpop.permute.xlu0 %1369 }
0x2036   :  { %2160 = vmatmul.mubr.msk.f32.vlgmr.msra.gmra.mrb[12].mxu0 %vm50_vm0, %v1370_v25 }
0x2037   :  { %2296 = vmatpush3.bf16.msra.mxu0 %v2729_v15  ;;  %2181 = vmatprep.mubr.msk.f32.mxu0 %vm2473_vm1, %v2474_v26 }
0x2038   :  { %2297 = vmatprep.subr.bf16.mxu0 %v2472_v23 }
0x203b   :  { %2299 = vmatpush3.bf16.msra.mxu0 %v2735_v17 }
0x203c   :  { %2306 = vmatprep.subr.bf16.mxu0 %v2472_v23 }
0x2109   :  { %v1439_v28 = vpop.f32.mrb[12].mxu0 }
0x210a   :  { %v1443_v29 = vadd.f32 %v1439_v28, %v2713_v63  ;;  %v2161_v12 = vpop.f32.mrb[13].mxu0 }
0x210c   :  { %2415 = vtanh.f32 %v1443_v29  ;;  %v1923_v32 = vmul.f32 -1.442695, %v1443_v29 }
0x210e   :  { %2417 = vpow2.f32 %v1923_v32 }
0x2116   :  { %v2416_v30 = vpop.eup %2415 }
0x2117   :  { %1456 = vrot.lane.b32.xlu1 %v2416_v30, %s2471_s22 }
0x2118   :  { %v2418_v33 = vpop.eup %2417 }
0x2119   :  { %v1447_v34 = vadd.f32 1.0, %v2418_v33 }
0x211b   :  { %2419 = vrcp.f32 %v1447_v34 }
0x2125   :  { %v2420_v35 = vpop.eup %2419 }
0x2126   :  { %v1454_v39 = vmul.f32 %v2420_v35, %v1452_v38 }
0x2189   :  { %v1457_v36 = vpop.permute.xlu1 %1456 }
0x218a   :  { %v1459_v37 = vmul.f32 %v2420_v35, %v1457_v36 }
0x218c   :  { %1461 = vrot.lane.b32.xlu0 %v1459_v37, %s2476_s29 }
0x21fe   :  { %v1462_v40 = vpop.permute.xlu0 %1461 }
0x21ff   :  { %v1464_v41 = vadd.f32 %v1462_v40, %v1454_v39  ;;  %v1792_v39 = vld [vmem:[%s2856_s7 + $0x8] sm:$0xff]  ;;  %v1793_v40 = vld [vmem:[%s2856_s7 + $0x10] sm:$0xff] }
0x2201   :  { %2421 = vtanh.f32 %v1464_v41 }
0x220b   :  { %v2422_v42 = vpop.eup %2421 }
0x220c   :  { %1467 = vrot.lane.b32.xlu1 %v2422_v42, %s2471_s22  ;;  %v1794_v42 = vld [vmem:[%s2856_s7 + $0x18] sm:$0xff] }
0x227e   :  { %v1468_v43 = vpop.permute.xlu1 %1467 }
0x227f   :  { %v1470_v44 = vmul.f32 %v2420_v35, %v1468_v43  ;;  %v2310_v43 = vpack.c.bf16 %v1794_v42, %v1793_v40 }
0x2281   :  { %1472 = vrot.lane.b32.xlu0 %v1470_v44, %s2476_s29 }
0x22f3   :  { %v1473_v10 = vpop.permute.xlu0 %1472 }
0x22f4   :  { %2171 = vmatmul.mubr.msk.f32.vlgmr.msra.gmra.mrb[12].mxu1 %vm50_vm0, %v1473_v10 }
0x22f5   :  { %2302 = vmatpush3.bf16.msra.mxu1 %v2729_v15  ;;  %2192 = vmatprep.mubr.msk.f32.mxu1 %vm2473_vm1, %v2474_v26 }
0x22f6   :  { %2303 = vmatprep.subr.bf16.mxu1 %v2472_v23 }
0x22f9   :  { %2305 = vmatpush3.bf16.msra.mxu1 %v2735_v17  ;;  %v1558_v17 = vrot.slane %v1464_v41, 6 }
0x23c7   :  { %v1542_v45 = vpop.f32.mrb[12].mxu1 }
0x23c8   :  { %v1547_v46 = vrot.slane %v1542_v45, 6  ;;  %v2172_v47 = vpop.f32.mrb[13].mxu1 }
0x23ca   :  { %v1549_v48 = vadd.f32 %v1547_v46, %v2713_v63 }
0x23cc   :  { %2423 = vtanh.f32 %v1549_v48  ;;  %v1925_v50 = vmul.f32 -1.442695, %v1549_v48  ;;  %v1930_v48 = vld [vmem:[%s2857_s8] ss:$0 sm:$0xff] }
0x23ce   :  { %2425 = vpow2.f32 %v1925_v50 }
0x23d6   :  { %v2424_v49 = vpop.eup %2423 }
0x23d7   :  { %1562 = vrot.lane.b32.xlu1 %v2424_v49, %s2471_s22 }
0x23d8   :  { %v2426_v51 = vpop.eup %2425 }
0x23d9   :  { %v1553_v15 = vadd.f32 1.0, %v2426_v51 }
0x23db   :  { %2427 = vrcp.f32 %v1553_v15 }
0x23e5   :  { %v2428_v31 = vpop.eup %2427 }
0x23e6   :  { %v1560_v54 = vmul.f32 %v2428_v31, %v1558_v17 }
0x2449   :  { %v1563_v52 = vpop.permute.xlu1 %1562 }
0x244a   :  { %v1565_v53 = vmul.f32 %v2428_v31, %v1563_v52 }
0x244c   :  { %1567 = vrot.lane.b32.xlu0 %v1565_v53, %s2476_s29 }
0x24be   :  { %v1568_v6 = vpop.permute.xlu0 %1567 }
0x24bf   :  { %v1570_v55 = vadd.f32 %v1568_v6, %v1560_v54 }
0x24c1   :  { %2429 = vtanh.f32 %v1570_v55 }
0x24cb   :  { %v2430_v56 = vpop.eup %2429 }
0x24cc   :  { %1573 = vrot.lane.b32.xlu1 %v2430_v56, %s2471_s22 }
0x253e   :  { %v1574_v57 = vpop.permute.xlu1 %1573 }
0x253f   :  { %v1576_v58 = vmul.f32 %v2428_v31, %v1574_v57 }
0x2541   :  { %v1578_v24 = vrot.slane %v1576_v58, 2 }
0x2543   :  { %1579 = vrot.lane.b32.xlu0 %v1578_v24, %s2476_s29 }
0x25b5   :  { %v1580_v59 = vpop.permute.xlu0 %1579 }
0x25b6   :  { %2182 = vmatmul.mubr.msk.f32.vlgmr.msra.gmra.mrb[14].mxu0 %vm50_vm0, %v1580_v59 }
0x25b7   :  { %2203 = vmatprep.mubr.msk.f32.mxu0 %vm2473_vm1, %v2474_v26  ;;  %v1665_v26 = vrot.slane %v1570_v55, 6 }
0x2689   :  { %v1649_v60 = vpop.f32.mrb[14].mxu0 }
0x268a   :  { %v1654_v61 = vrot.slane %v1649_v60, 4  ;;  %v2183_v62 = vpop.f32.mrb[15].mxu0 }
0x268c   :  { %v1656_v27 = vadd.f32 %v1654_v61, %v2713_v63 }
0x268e   :  { %2431 = vtanh.f32 %v1656_v27  ;;  %v1927_v2 = vmul.f32 -1.442695, %v1656_v27 }
0x2690   :  { %2433 = vpow2.f32 %v1927_v2 }
0x2698   :  { %v2432_v0 = vpop.eup %2431 }
0x2699   :  { %1669 = vrot.lane.b32.xlu1 %v2432_v0, %s2471_s22 }
0x269a   :  { %v2434_v3 = vpop.eup %2433 }
0x269b   :  { %v1660_v4 = vadd.f32 1.0, %v2434_v3 }
0x269d   :  { %2435 = vrcp.f32 %v1660_v4 }
0x26a7   :  { %v2436_v5 = vpop.eup %2435 }
0x26a8   :  { %v1667_v9 = vmul.f32 %v2436_v5, %v1665_v26 }
0x270b   :  { %v1670_v7 = vpop.permute.xlu1 %1669 }
0x270c   :  { %v1672_v8 = vmul.f32 %v2436_v5, %v1670_v7 }
0x270e   :  { %1674 = vrot.lane.b32.xlu0 %v1672_v8, %s2476_s29 }
0x2780   :  { %v1675_v11 = vpop.permute.xlu0 %1674 }
0x2781   :  { %v1677_v13 = vadd.f32 %v1675_v11, %v1667_v9 }
0x2783   :  { %2437 = vtanh.f32 %v1677_v13  ;;  %v1772_v35 = vrot.slane %v1677_v13, 6 }
0x278d   :  { %v2438_v14 = vpop.eup %2437 }
0x278e   :  { %1680 = vrot.lane.b32.xlu1 %v2438_v14, %s2471_s22 }
0x2800   :  { %v1681_v16 = vpop.permute.xlu1 %1680 }
0x2801   :  { %v1683_v18 = vmul.f32 %v2436_v5, %v1681_v16 }
0x2803   :  { %v1685_v19 = vrot.slane %v1683_v18, 4 }
0x2805   :  { %1686 = vrot.lane.b32.xlu0 %v1685_v19, %s2476_s29 }
0x2877   :  { %v1687_v1 = vpop.permute.xlu0 %1686 }
0x2878   :  { %2193 = vmatmul.mubr.msk.f32.vlgmr.msra.gmra.mrb[14].mxu1 %vm50_vm0, %v1687_v1 }
0x294b   :  { %v1756_v20 = vpop.f32.mrb[14].mxu1 }
0x294c   :  { %v1761_v21 = vrot.slane %v1756_v20, 2  ;;  %v2194_v22 = vpop.f32.mrb[15].mxu1 }
0x294e   :  { %v1763_v25 = vadd.f32 %v1761_v21, %v2713_v63  ;;  %v1791_v63 = vld [vmem:[%s2856_s7] sm:$0xff]  ;;  %s2477_s7 = smov [#allocation3]  }
0x294f   :  { %v2307_v41 = vpack.c.bf16 %v1792_v39, %v1791_v63  ;;  %s1886_s11 = sshll.u32 %s2477_s7, 4  ;;  %s1887_s11 = int_to_ptr.vmem [resolvable:$true] %s1886_s11 }
0x2950   :  { %2439 = vtanh.f32 %v1763_v25  ;;  %v1929_v29 = vmul.f32 -1.442695, %v1763_v25  ;;  %p2452_p1 = scmp.lt.s32.totalorder %s1887_s11, %s1887_s11 }
0x2951   :  { %2308 = vmatpush3.bf16.msra.mxu0 %v2307_v41 }
0x2952   :  { %2441 = vpow2.f32 %v1929_v29  ;;  %2309 = vmatprep.subr.bf16.mxu0 %v2472_v23 }
0x2955   :  { %2311 = vmatpush3.bf16.msra.mxu0 %v2310_v43 }
0x295a   :  { %v2440_v28 = vpop.eup %2439 }
0x295b   :  { %1776 = vrot.lane.b32.xlu1 %v2440_v28, %s2471_s22 }
0x295c   :  { %v2442_v12 = vpop.eup %2441 }
0x295d   :  { %v1767_v30 = vadd.f32 1.0, %v2442_v12 }
0x295f   :  { %2443 = vrcp.f32 %v1767_v30 }
0x2969   :  { %v2444_v32 = vpop.eup %2443 }
0x296a   :  { %v1774_v36 = vmul.f32 %v2444_v32, %v1772_v35 }
0x29cd   :  { %v1777_v33 = vpop.permute.xlu1 %1776 }
0x29ce   :  { %v1779_v34 = vmul.f32 %v2444_v32, %v1777_v33 }
0x29d0   :  { %1781 = vrot.lane.b32.xlu0 %v1779_v34, %s2476_s29 }
0x2a42   :  { %v1782_v37 = vpop.permute.xlu0 %1781 }
0x2a43   :  { %v1784_v38 = vadd.f32 %v1782_v37, %v1774_v36 }
0x2a45   :  { %2445 = vtanh.f32 %v1784_v38 }
0x2a4f   :  { %v2446_v44 = vpop.eup %2445 }
0x2a50   :  { %1787 = vrot.lane.b32.xlu1 %v2446_v44, %s2471_s22  ;;  %s2447_s22 = scalar_lea.vmem %s1887_s11, 32 }
0x2a51   :  { %p2448_p0 = scmp.ne.s32.totalorder %s1887_s11, %s2447_s22  ;;  %p2453_p2 = scmp.lt.s32.totalorder %s2447_s22, %s2447_s22 }
0x2a53   :  { %p2454_p3 = por %p2453_p2, %p2452_p1 }
0x2a55   :  { %p2455_p4 = pnand %p2454_p3, %p2448_p0 }
0x2ac2   :  { %v1788_v10 = vpop.permute.xlu1 %1787 }
0x2ac3   :  { %v1790_v45 = vmul.f32 %v2444_v32, %v1788_v10 }
0x2ac5   :  { %v1803_v46 = vrot.slane %v1790_v45, 6 }
0x2ac7   :  { %1804 = vrot.lane.b32.xlu0 %v1803_v46, %s2476_s29 }
0x2b39   :  { %v1805_v47 = vpop.permute.xlu0 %1804 }
0x2b3a   :  { %2204 = vmatmul.mubr.msk.f32.vlgmr.msra.gmra.mrb[16].mxu0 %vm50_vm0, %v1805_v47 }
0x2c0d   :  { %v1874_v49 = vpop.f32.mrb[16].mxu0 }
0x2c0e   :  { %v1875_v23 = vadd.f32 %v1930_v48, %v1874_v49  ;;  %v2205_v50 = vpop.f32.mrb[17].mxu0 }
0x2c10   :  { %1879 = vst.msk [vmem:[#allocation3] sm:$0x3] %vm1878_vm6, %v1875_v23 }
0x2c11   :  { %2458 = shalt.err (!%p2455_p4)
}
0x2c12   :  { %s2459_s13 = scalar_lea.hbm %s2858_s9, 32 }
0x2c13   :  { %p2460_p5 = scmp.ne.s32.totalorder %s2858_s9, %s2459_s13  ;;  %p2463_p6 = scmp.lt.u32.totalorder %s2459_s13, %s2858_s9 }
0x2c15   :  { %p2465_p7 = pnand %p2463_p6, %p2460_p5 }
0x2c17   :  { %2468 = shalt.err (!%p2465_p7)
}
0x2c18   :  { %1889 = dma.vmem_to_hbm [thread:$0]  %s1887_s11, 32, %s2858_s9, [#allocation4]  }
0x2c19   :  { %2469 = dma.done.wait [#allocation4], 32  }
0x2c1a   :  { %2470 = vsyncadd [#allocation4], 4294967264 }
0x2c1b   :  { %1893 = vsyncpa [#allocation4], 1 }

</bundles_post_ra>
